<compile_context>
chip_gen: v7x
topology: tpu7x:2x2x1
jax: 0.10.0
libtpu: 0.0.40
codegen_flags: <defaults>
</compile_context>

<pallas_src>
import functools

import jax
import jax.numpy as jnp
from jax.experimental import pallas as pl
from jax.experimental.pallas import tpu as pltpu

GIN_EPS = 0.0  # GINConv default (learn_eps=False)


# --------------------------------------------------------------------------
# Fused kernel: L x (GIN conv + ReLU + mean/max readout + LSTM step) -> head
# One grid step = one group of GB graphs; everything stays in VMEM/vregs.
# --------------------------------------------------------------------------
def _fused_kernel(adj_ref, x_ref,
                  w1a_ref, w2a_ref, w1s_ref, w2s_ref, bconv_ref,   # GIN convs
                  wl_ref, bl_ref,                                   # fused LSTM
                  wlin_ref, blin_ref, w3_ref, b3_ref,               # lin_lstm, lin3
                  out_ref):
    GB, N, _ = adj_ref.shape
    H = w2a_ref.shape[1]
    Lm1 = w1s_ref.shape[0]

    adj_bf = adj_ref[...]        # bf16 0/1 mask — never materialized in f32
    h = x_ref[...]               # f32 [GB, N, Cin]

    def gin_layer(h3, w1, b1, w2, b2):
        # GIN aggregation: h_i + sum_{j in N(i)} h_j — bf16 MXU, f32 accumulate.
        agg = jnp.einsum('bij,bjc->bic', adj_bf, h3.astype(jnp.bfloat16),
                         preferred_element_type=jnp.float32)
        if GIN_EPS == 0.0:
            pre = h3 + agg
        else:
            pre = (1.0 + GIN_EPS) * h3 + agg
        pre = pre.reshape(GB * N, h3.shape[-1])
        # apply-fn: Linear -> ReLU -> Linear, then outer ReLU (slab matmuls).
        z = jnp.maximum(jnp.dot(pre.astype(jnp.bfloat16), w1,
                                preferred_element_type=jnp.float32) + b1, 0.0)
        hn = jnp.dot(z.astype(jnp.bfloat16), w2,
                     preferred_element_type=jnp.float32) + b2
        return jnp.maximum(hn, 0.0).reshape(GB, N, H)

    def lstm_step(h3, hS, cS):
        # readout (mean | max, f32) + ONE fused gate matmul [GB,3H]@[3H,4H].
        mean_r = jnp.mean(h3, axis=1)                      # [GB, H]
        max_r = jnp.max(h3, axis=1)                        # [GB, H]
        xcat = jnp.concatenate([mean_r, max_r, hS], axis=-1)   # [GB, 3H]
        g4 = (jnp.dot(xcat.astype(jnp.bfloat16), wl_ref[...],
                      preferred_element_type=jnp.float32) + bl_ref[...])
        i_g = jax.nn.sigmoid(g4[:, 0 * H:1 * H])           # torch gate order
        f_g = jax.nn.sigmoid(g4[:, 1 * H:2 * H])
        g_g = jnp.tanh(g4[:, 2 * H:3 * H])
        o_g = jax.nn.sigmoid(g4[:, 3 * H:4 * H])
        cS = f_g * cS + i_g * g_g
        hS = o_g * jnp.tanh(cS)
        return hS, cS

    hS = jnp.zeros((GB, H), jnp.float32)
    cS = jnp.zeros((GB, H), jnp.float32)

    # Layer 0 (Cin -> H), then layers 1..L-1 (H -> H); LSTM step interleaved.
    bc = bconv_ref[0]
    h = gin_layer(h, w1a_ref[...], bc[0:1], w2a_ref[...], bc[1:2])
    hS, cS = lstm_step(h, hS, cS)
    for l in range(Lm1):                                   # static, small L
        bc = bconv_ref[l + 1]
        h = gin_layer(h, w1s_ref[l], bc[0:1], w2s_ref[l], bc[1:2])
        hS, cS = lstm_step(h, hS, cS)

    # out_lstm[:, -1, :] == hS ; n_feat = relu(lin_lstm(hS)) ; dropout(p=0) ; lin3
    feat = jnp.maximum(
        jnp.dot(hS, wlin_ref[...], preferred_element_type=jnp.float32)
        + blin_ref[...], 0.0)
    out_ref[0] = (jnp.dot(feat, w3_ref[...], preferred_element_type=jnp.float32)
                  + b3_ref[...])


def _full_spec(a):
    nd = a.ndim
    return pl.BlockSpec(a.shape, lambda g, _nd=nd: (0,) * _nd)


# --------------------------------------------------------------------------
# Per-generation sizing helpers (trace-time Python)
# --------------------------------------------------------------------------
def _tpu_kind():
    try:
        return jax.devices()[0].device_kind.lower()
    except Exception:
        return ""


def _vmem_cap_bytes():
    try:
        return int(pltpu.get_tpu_info().vmem_capacity_bytes)
    except Exception:
        return 64 << 20  # safe lower bound (v7x per-TC VMEM)


def _choose_group_count(B, N, Cin, H):
    """Number of grid steps G; each step processes GB = B // G graphs."""
    kind = _tpu_kind()
    num_cores = 2 if "v7" in kind else 1        # v7x: 2 TensorCores / chip
    min_rows = 128 if "v5" in kind else 256     # minimum MXU slab height
    # per-graph per-step bytes: bf16 adjacency + f32 features + f32 activations
    per_graph = N * N * 2 + N * Cin * 4 + 4 * N * H * 4
    budget = 20 << 20                           # headroom under scoped VMEM
    divisors = [g for g in range(1, B + 1) if B % g == 0]

    def fits(g):
        return 2 * (B // g) * per_graph <= budget   # x2: double buffering

    if num_cores >= 2:
        # v7x: want >=2 pipelined steps per core (DMA hidden) if the slab
        # stays wide enough and the step working set fits VMEM.
        for g in divisors:
            if g >= 2 * num_cores and fits(g) and (B // g) * N >= min_rows:
                return g
        for g in divisors:                       # at least one step per core
            if g >= num_cores and fits(g):
                return g
    for g in divisors:                           # 1-TC: widest slab that fits
        if fits(g):
            return g
    return B


def _vmem_limit_bytes(GB, N, Cin, H, L, Out):
    f32, b16 = 4, 2
    C = max(Cin, H)
    # double-buffered pipelined inputs / output
    io = 2 * (GB * N * N * b16 + GB * N * Cin * f32) + 2 * GB * Out * f32
    # weights (counted with x2 buffering to be conservative)
    w = (Cin * H + H * H + 2 * (L - 1) * H * H) * b16          # GIN MLP (bf16)
    w += L * 2 * H * f32                                       # conv biases
    w += 3 * H * 4 * H * b16 + 4 * H * f32                     # fused LSTM
    w += (H * H + H * Out + H + Out) * f32                     # heads
    # live activations inside one step (f32 slabs + bf16 matmul operands)
    acts = GB * N * (C + 3 * H) * f32 + 2 * GB * N * C * b16
    est = io + 2 * w + acts
    cap = _vmem_cap_bytes()
    return int(max(16 << 20, min(cap - (8 << 20), 2 * est + (4 << 20))))


# --------------------------------------------------------------------------
# Forward wrapper: host-side weight restructuring + single pallas_call
# --------------------------------------------------------------------------
@functools.partial(jax.jit, static_argnames=("conv_layers",))
def model_forward(params, adj, n_feat, conv_layers):
    B, N, Cin = n_feat.shape
    H = params["whh_t"].shape[0]
    Out = params["w3_t"].shape[1]
    L = conv_layers
    assert L >= 2, "fused kernel expects conv_layers >= 2"

    G = _choose_group_count(B, N, Cin, H)
    GB = B // G

    adj_bf16 = adj.astype(jnp.bfloat16)          # exact for a 0/1 mask, half DMA

    # Conv layer 0 kept separate (Cin may differ from H); layers 1..L-1 stacked.
    conv = params["conv"]
    w1a = conv[0]["w1"].astype(jnp.bfloat16)                        # [Cin, H]
    w2a = conv[0]["w2"].astype(jnp.bfloat16)                        # [H, H]
    w1s = jnp.stack([conv[i]["w1"] for i in range(1, L)]).astype(jnp.bfloat16)
    w2s = jnp.stack([conv[i]["w2"] for i in range(1, L)]).astype(jnp.bfloat16)
    # all conv biases packed into one f32 tensor: bconv[l, 0]=b1_l, [l, 1]=b2_l
    bconv = jnp.stack([jnp.concatenate([conv[i]["b1"], conv[i]["b2"]], axis=0)
                       for i in range(L)])                          # [L, 2, H]

    # LSTM: fused gate weight for x = mean || max || h_prev; biases pre-summed.
    w_lstm = jnp.concatenate([params["wih_t"], params["whh_t"]],
                             axis=0).astype(jnp.bfloat16)           # [3H, 4H]
    b_lstm = params["bih"] + params["bhh"]                          # [1, 4H]

    args = (adj_bf16, n_feat,
            w1a, w2a, w1s, w2s, bconv,
            w_lstm, b_lstm,
            params["wlin_t"], params["blin"], params["w3_t"], params["b3"])

    in_specs = [
        pl.BlockSpec((GB, N, N), lambda g: (g, 0, 0)),
        pl.BlockSpec((GB, N, Cin), lambda g: (g, 0, 0)),
    ] + [_full_spec(a) for a in args[2:]]

    out = pl.pallas_call(
        _fused_kernel,
        out_shape=jax.ShapeDtypeStruct((G, GB, Out), jnp.float32),
        grid=(G,),
        in_specs=in_specs,
        out_specs=pl.BlockSpec((1, GB, Out), lambda g: (g, 0, 0)),
        compiler_params=pltpu.CompilerParams(
            dimension_semantics=("parallel",),
            vmem_limit_bytes=_vmem_limit_bytes(GB, N, Cin, H, L, Out)),
    )(*args)
    return out.reshape(B, Out)


# --------------------------------------------------------------------------
# Parameter init (deterministic, synthetic)
# --------------------------------------------------------------------------
def init_params(key, in_feat, out_feat, hid_feat, conv_layers):
    H = hid_feat
    ks = iter(jax.random.split(key, 4 * conv_layers + 8))

    def dense(k, shape, scale=0.1):
        return scale * jax.random.normal(k, shape, jnp.float32)

    conv = []
    for i in range(conv_layers):
        cin = in_feat if i == 0 else H
        conv.append(dict(
            w1=dense(next(ks), (cin, H)),
            b1=dense(next(ks), (1, H)),
            w2=dense(next(ks), (H, H)),
            b2=dense(next(ks), (1, H)),
        ))
    params = dict(conv=conv)
    # torch LSTM weights [4H, in] / [4H, H] stored transposed for x @ W
    params["wih_t"] = dense(next(ks), (2 * H, 4 * H))
    params["whh_t"] = dense(next(ks), (H, 4 * H))
    params["bih"] = dense(next(ks), (1, 4 * H))
    params["bhh"] = dense(next(ks), (1, 4 * H))
    # lin_lstm: [H, H], lin3: [out, H] — stored transposed
    params["wlin_t"] = dense(next(ks), (H, H))
    params["blin"] = dense(next(ks), (1, H))
    params["w3_t"] = dense(next(ks), (H, out_feat))
    params["b3"] = dense(next(ks), (1, out_feat))
    return params


if __name__ == "__main__":
    key = jax.random.PRNGKey(0)
    B, N = 2, 16
    in_feat, hid_feat, out_feat = 8, 32, 4
    conv_layers = 3

    k_adj, k_feat, k_par = jax.random.split(key, 3)
    a = (jax.random.uniform(k_adj, (B, N, N)) < 0.3).astype(jnp.float32)
    adj = jnp.maximum(a, jnp.transpose(a, (0, 2, 1)))        # symmetric
    adj = adj * (1.0 - jnp.eye(N, dtype=jnp.float32)[None])  # no self loops
    n_feat = jax.random.normal(k_feat, (B, N, in_feat), jnp.float32)

    params = init_params(k_par, in_feat, out_feat, hid_feat, conv_layers)

    out = model_forward(params, adj, n_feat, conv_layers=conv_layers)
    out = jax.block_until_ready(out)
    assert out.shape == (B, out_feat)
    assert bool(jnp.all(jnp.isfinite(out)))
    print("KERNEL_OK")
</pallas_src>

<mosaic_0001>
module attributes {stable_mosaic.version = 11 : i64} {
  func.func @_fused_kernel(%arg0: i32, %arg1: memref<2x16x16xbf16, #tpu.memory_space<vmem>>, %arg2: memref<2x16x8xf32, #tpu.memory_space<vmem>>, %arg3: memref<8x32xbf16, #tpu.memory_space<vmem>>, %arg4: memref<32x32xbf16, #tpu.memory_space<vmem>>, %arg5: memref<2x32x32xbf16, #tpu.memory_space<vmem>>, %arg6: memref<2x32x32xbf16, #tpu.memory_space<vmem>>, %arg7: memref<3x2x32xf32, #tpu.memory_space<vmem>>, %arg8: memref<96x128xbf16, #tpu.memory_space<vmem>>, %arg9: memref<1x128xf32, #tpu.memory_space<vmem>>, %arg10: memref<32x32xf32, #tpu.memory_space<vmem>>, %arg11: memref<1x32xf32, #tpu.memory_space<vmem>>, %arg12: memref<32x4xf32, #tpu.memory_space<vmem>>, %arg13: memref<1x4xf32, #tpu.memory_space<vmem>>, %arg14: memref<1x2x4xf32, #tpu.memory_space<vmem>>) attributes {dimension_semantics = [#tpu.dimension_semantics<parallel>], iteration_bounds = array<i64: 1>, scalar_prefetch = 0 : i64, scratch_operands = 0 : i64, tpu.core_type = #tpu.core_type<tc>, window_params = [{transform_indices = @transform_0, window_bounds = array<i64: 2, 16, 16>}, {transform_indices = @transform_1, window_bounds = array<i64: 2, 16, 8>}, {pipeline_mode = #tpu.pipeline_mode<synchronous>, transform_indices = @transform_2, window_bounds = array<i64: 8, 32>}, {pipeline_mode = #tpu.pipeline_mode<synchronous>, transform_indices = @transform_3, window_bounds = array<i64: 32, 32>}, {pipeline_mode = #tpu.pipeline_mode<synchronous>, transform_indices = @transform_4, window_bounds = array<i64: 2, 32, 32>}, {pipeline_mode = #tpu.pipeline_mode<synchronous>, transform_indices = @transform_5, window_bounds = array<i64: 2, 32, 32>}, {pipeline_mode = #tpu.pipeline_mode<synchronous>, transform_indices = @transform_6, window_bounds = array<i64: 3, 2, 32>}, {pipeline_mode = #tpu.pipeline_mode<synchronous>, transform_indices = @transform_7, window_bounds = array<i64: 96, 128>}, {pipeline_mode = #tpu.pipeline_mode<synchronous>, transform_indices = @transform_8, window_bounds = array<i64: 1, 128>}, {pipeline_mode = #tpu.pipeline_mode<synchronous>, transform_indices = @transform_9, window_bounds = array<i64: 32, 32>}, {pipeline_mode = #tpu.pipeline_mode<synchronous>, transform_indices = @transform_10, window_bounds = array<i64: 1, 32>}, {pipeline_mode = #tpu.pipeline_mode<synchronous>, transform_indices = @transform_11, window_bounds = array<i64: 32, 4>}, {pipeline_mode = #tpu.pipeline_mode<synchronous>, transform_indices = @transform_12, window_bounds = array<i64: 1, 4>}, {transform_indices = @transform_13, window_bounds = array<i64: 1, 2, 4>}]} {
    %c0 = arith.constant 0 : index
    %c0_0 = arith.constant 0 : index
    %c0_1 = arith.constant 0 : index
    %0 = vector.load %arg1[%c0, %c0_0, %c0_1] : memref<2x16x16xbf16, #tpu.memory_space<vmem>>, vector<2x16x16xbf16>
    %c0_2 = arith.constant 0 : index
    %c0_3 = arith.constant 0 : index
    %c0_4 = arith.constant 0 : index
    %1 = vector.load %arg2[%c0_2, %c0_3, %c0_4] : memref<2x16x8xf32, #tpu.memory_space<vmem>>, vector<2x16x8xf32>
    %cst = arith.constant 0.000000e+00 : f32
    %2 = vector.broadcast %cst : f32 to vector<2x32xf32>
    %cst_5 = arith.constant 0.000000e+00 : f32
    %3 = vector.broadcast %cst_5 : f32 to vector<2x32xf32>
    %c0_6 = arith.constant 0 : index
    %c0_7 = arith.constant 0 : index
    %c0_8 = arith.constant 0 : index
    %4 = vector.load %arg7[%c0_6, %c0_7, %c0_8] : memref<3x2x32xf32, #tpu.memory_space<vmem>>, vector<1x2x32xf32>
    %5 = vector.shape_cast %4 : vector<1x2x32xf32> to vector<2x32xf32>
    %c0_9 = arith.constant 0 : index
    %c0_10 = arith.constant 0 : index
    %6 = vector.load %arg3[%c0_9, %c0_10] : memref<8x32xbf16, #tpu.memory_space<vmem>>, vector<8x32xbf16>
    %7 = vector.extract_strided_slice %5 {offsets = [0, 0], sizes = [1, 32], strides = [1, 1]} : vector<2x32xf32> to vector<1x32xf32>
    %c0_11 = arith.constant 0 : index
    %c0_12 = arith.constant 0 : index
    %8 = vector.load %arg4[%c0_11, %c0_12] : memref<32x32xbf16, #tpu.memory_space<vmem>>, vector<32x32xbf16>
    %9 = vector.extract_strided_slice %5 {offsets = [1, 0], sizes = [1, 32], strides = [1, 1]} : vector<2x32xf32> to vector<1x32xf32>
    %10 = arith.truncf %1 : vector<2x16x8xf32> to vector<2x16x8xbf16>
    "tpu.trace_start"() <{level = 10 : i32, message = "bij,bjc->bic"}> : () -> ()
    %cst_13 = arith.constant dense<0.000000e+00> : vector<2x16x8xf32>
    %11 = tpu.matmul %0, %10, %cst_13 {dimension_numbers = #tpu.dot_dimension_numbers<[2], [1], [1], [2], [0, 0, 0, 1, 1, 2], [0], [0]>} : vector<2x16x16xbf16>, vector<2x16x8xbf16>, vector<2x16x8xf32> -> vector<2x16x8xf32>
    "tpu.trace_stop"() : () -> ()
    %12 = arith.addf %1, %11 : vector<2x16x8xf32>
    %13 = vector.shape_cast %12 : vector<2x16x8xf32> to vector<32x8xf32>
    %14 = arith.truncf %13 : vector<32x8xf32> to vector<32x8xbf16>
    %cst_14 = arith.constant dense<0.000000e+00> : vector<32x32xf32>
    %15 = tpu.matmul %14, %6, %cst_14 {dimension_numbers = #tpu.dot_dimension_numbers<[1], [0], [0], [1], [0, 0, 1, 1], [], []>} : vector<32x8xbf16>, vector<8x32xbf16>, vector<32x32xf32> -> vector<32x32xf32>
    %16 = vector.broadcast %7 : vector<1x32xf32> to vector<32x32xf32>
    %17 = arith.addf %15, %16 : vector<32x32xf32>
    %cst_15 = arith.constant 0.000000e+00 : f32
    %18 = vector.broadcast %cst_15 : f32 to vector<32x32xf32>
    %19 = arith.maximumf %17, %18 : vector<32x32xf32>
    %20 = arith.truncf %19 : vector<32x32xf32> to vector<32x32xbf16>
    %cst_16 = arith.constant dense<0.000000e+00> : vector<32x32xf32>
    %21 = tpu.matmul %20, %8, %cst_16 {dimension_numbers = #tpu.dot_dimension_numbers<[1], [0], [0], [1], [0, 0, 1, 1], [], []>} : vector<32x32xbf16>, vector<32x32xbf16>, vector<32x32xf32> -> vector<32x32xf32>
    %22 = vector.broadcast %9 : vector<1x32xf32> to vector<32x32xf32>
    %23 = arith.addf %21, %22 : vector<32x32xf32>
    %cst_17 = arith.constant 0.000000e+00 : f32
    %24 = vector.broadcast %cst_17 : f32 to vector<32x32xf32>
    %25 = arith.maximumf %23, %24 : vector<32x32xf32>
    %26 = vector.shape_cast %25 : vector<32x32xf32> to vector<2x16x32xf32>
    %cst_18 = arith.constant dense<0.000000e+00> : vector<2x32xf32>
    %27 = vector.multi_reduction <add>, %26, %cst_18 [1] : vector<2x16x32xf32> to vector<2x32xf32>
    %cst_19 = arith.constant 1.600000e+01 : f32
    %28 = vector.broadcast %cst_19 : f32 to vector<2x32xf32>
    %29 = arith.divf %27, %28 : vector<2x32xf32>
    %cst_20 = arith.constant dense<0xFF800000> : vector<2x32xf32>
    %30 = vector.multi_reduction <maximumf>, %26, %cst_20 [1] : vector<2x16x32xf32> to vector<2x32xf32>
    %31 = tpu.concatenate %29, %30, %2 in 1 : vector<2x32xf32>, vector<2x32xf32>, vector<2x32xf32> -> vector<2x96xf32>
    %32 = arith.truncf %31 : vector<2x96xf32> to vector<2x96xbf16>
    %c0_21 = arith.constant 0 : index
    %c0_22 = arith.constant 0 : index
    %33 = vector.load %arg8[%c0_21, %c0_22] : memref<96x128xbf16, #tpu.memory_space<vmem>>, vector<96x128xbf16>
    %cst_23 = arith.constant dense<0.000000e+00> : vector<2x128xf32>
    %34 = tpu.matmul %32, %33, %cst_23 {dimension_numbers = #tpu.dot_dimension_numbers<[1], [0], [0], [1], [0, 0, 1, 1], [], []>} : vector<2x96xbf16>, vector<96x128xbf16>, vector<2x128xf32> -> vector<2x128xf32>
    %c0_24 = arith.constant 0 : index
    %c0_25 = arith.constant 0 : index
    %35 = vector.load %arg9[%c0_24, %c0_25] : memref<1x128xf32, #tpu.memory_space<vmem>>, vector<1x128xf32>
    %36 = vector.broadcast %35 : vector<1x128xf32> to vector<2x128xf32>
    %37 = arith.addf %34, %36 : vector<2x128xf32>
    %38 = vector.extract_strided_slice %37 {offsets = [0, 0], sizes = [2, 32], strides = [1, 1]} : vector<2x128xf32> to vector<2x32xf32>
    %39 = arith.negf %38 : vector<2x32xf32>
    %40 = math.exp %39 : vector<2x32xf32>
    %cst_26 = arith.constant 1.000000e+00 : f32
    %41 = vector.broadcast %cst_26 : f32 to vector<2x32xf32>
    %42 = arith.addf %41, %40 : vector<2x32xf32>
    %43 = arith.divf %41, %42 : vector<2x32xf32>
    %44 = vector.extract_strided_slice %37 {offsets = [0, 32], sizes = [2, 32], strides = [1, 1]} : vector<2x128xf32> to vector<2x32xf32>
    %45 = arith.negf %44 : vector<2x32xf32>
    %46 = math.exp %45 : vector<2x32xf32>
    %cst_27 = arith.constant 1.000000e+00 : f32
    %47 = vector.broadcast %cst_27 : f32 to vector<2x32xf32>
    %48 = arith.addf %47, %46 : vector<2x32xf32>
    %49 = arith.divf %47, %48 : vector<2x32xf32>
    %50 = vector.extract_strided_slice %37 {offsets = [0, 64], sizes = [2, 32], strides = [1, 1]} : vector<2x128xf32> to vector<2x32xf32>
    %51 = math.tanh %50 : vector<2x32xf32>
    %52 = vector.extract_strided_slice %37 {offsets = [0, 96], sizes = [2, 32], strides = [1, 1]} : vector<2x128xf32> to vector<2x32xf32>
    %53 = arith.negf %52 : vector<2x32xf32>
    %54 = math.exp %53 : vector<2x32xf32>
    %cst_28 = arith.constant 1.000000e+00 : f32
    %55 = vector.broadcast %cst_28 : f32 to vector<2x32xf32>
    %56 = arith.addf %55, %54 : vector<2x32xf32>
    %57 = arith.divf %55, %56 : vector<2x32xf32>
    %58 = arith.mulf %49, %3 : vector<2x32xf32>
    %59 = arith.mulf %43, %51 : vector<2x32xf32>
    %60 = arith.addf %58, %59 : vector<2x32xf32>
    %61 = math.tanh %60 : vector<2x32xf32>
    %62 = arith.mulf %57, %61 : vector<2x32xf32>
    %c1 = arith.constant 1 : index
    %c0_29 = arith.constant 0 : index
    %c0_30 = arith.constant 0 : index
    %63 = vector.load %arg7[%c1, %c0_29, %c0_30] : memref<3x2x32xf32, #tpu.memory_space<vmem>>, vector<1x2x32xf32>
    %64 = vector.shape_cast %63 : vector<1x2x32xf32> to vector<2x32xf32>
    %c0_31 = arith.constant 0 : index
    %c0_32 = arith.constant 0 : index
    %c0_33 = arith.constant 0 : index
    %65 = vector.load %arg5[%c0_31, %c0_32, %c0_33] : memref<2x32x32xbf16, #tpu.memory_space<vmem>>, vector<1x32x32xbf16>
    %66 = vector.shape_cast %65 : vector<1x32x32xbf16> to vector<32x32xbf16>
    %67 = vector.extract_strided_slice %64 {offsets = [0, 0], sizes = [1, 32], strides = [1, 1]} : vector<2x32xf32> to vector<1x32xf32>
    %c0_34 = arith.constant 0 : index
    %c0_35 = arith.constant 0 : index
    %c0_36 = arith.constant 0 : index
    %68 = vector.load %arg6[%c0_34, %c0_35, %c0_36] : memref<2x32x32xbf16, #tpu.memory_space<vmem>>, vector<1x32x32xbf16>
    %69 = vector.shape_cast %68 : vector<1x32x32xbf16> to vector<32x32xbf16>
    %70 = vector.extract_strided_slice %64 {offsets = [1, 0], sizes = [1, 32], strides = [1, 1]} : vector<2x32xf32> to vector<1x32xf32>
    %71 = arith.truncf %26 : vector<2x16x32xf32> to vector<2x16x32xbf16>
    "tpu.trace_start"() <{level = 10 : i32, message = "bij,bjc->bic"}> : () -> ()
    %cst_37 = arith.constant dense<0.000000e+00> : vector<2x16x32xf32>
    %72 = tpu.matmul %0, %71, %cst_37 {dimension_numbers = #tpu.dot_dimension_numbers<[2], [1], [1], [2], [0, 0, 0, 1, 1, 2], [0], [0]>} : vector<2x16x16xbf16>, vector<2x16x32xbf16>, vector<2x16x32xf32> -> vector<2x16x32xf32>
    "tpu.trace_stop"() : () -> ()
    %73 = arith.addf %26, %72 : vector<2x16x32xf32>
    %74 = vector.shape_cast %73 : vector<2x16x32xf32> to vector<32x32xf32>
    %75 = arith.truncf %74 : vector<32x32xf32> to vector<32x32xbf16>
    %cst_38 = arith.constant dense<0.000000e+00> : vector<32x32xf32>
    %76 = tpu.matmul %75, %66, %cst_38 {dimension_numbers = #tpu.dot_dimension_numbers<[1], [0], [0], [1], [0, 0, 1, 1], [], []>} : vector<32x32xbf16>, vector<32x32xbf16>, vector<32x32xf32> -> vector<32x32xf32>
    %77 = vector.broadcast %67 : vector<1x32xf32> to vector<32x32xf32>
    %78 = arith.addf %76, %77 : vector<32x32xf32>
    %cst_39 = arith.constant 0.000000e+00 : f32
    %79 = vector.broadcast %cst_39 : f32 to vector<32x32xf32>
    %80 = arith.maximumf %78, %79 : vector<32x32xf32>
    %81 = arith.truncf %80 : vector<32x32xf32> to vector<32x32xbf16>
    %cst_40 = arith.constant dense<0.000000e+00> : vector<32x32xf32>
    %82 = tpu.matmul %81, %69, %cst_40 {dimension_numbers = #tpu.dot_dimension_numbers<[1], [0], [0], [1], [0, 0, 1, 1], [], []>} : vector<32x32xbf16>, vector<32x32xbf16>, vector<32x32xf32> -> vector<32x32xf32>
    %83 = vector.broadcast %70 : vector<1x32xf32> to vector<32x32xf32>
    %84 = arith.addf %82, %83 : vector<32x32xf32>
    %cst_41 = arith.constant 0.000000e+00 : f32
    %85 = vector.broadcast %cst_41 : f32 to vector<32x32xf32>
    %86 = arith.maximumf %84, %85 : vector<32x32xf32>
    %87 = vector.shape_cast %86 : vector<32x32xf32> to vector<2x16x32xf32>
    %cst_42 = arith.constant dense<0.000000e+00> : vector<2x32xf32>
    %88 = vector.multi_reduction <add>, %87, %cst_42 [1] : vector<2x16x32xf32> to vector<2x32xf32>
    %cst_43 = arith.constant 1.600000e+01 : f32
    %89 = vector.broadcast %cst_43 : f32 to vector<2x32xf32>
    %90 = arith.divf %88, %89 : vector<2x32xf32>
    %cst_44 = arith.constant dense<0xFF800000> : vector<2x32xf32>
    %91 = vector.multi_reduction <maximumf>, %87, %cst_44 [1] : vector<2x16x32xf32> to vector<2x32xf32>
    %92 = tpu.concatenate %90, %91, %62 in 1 : vector<2x32xf32>, vector<2x32xf32>, vector<2x32xf32> -> vector<2x96xf32>
    %93 = arith.truncf %92 : vector<2x96xf32> to vector<2x96xbf16>
    %c0_45 = arith.constant 0 : index
    %c0_46 = arith.constant 0 : index
    %94 = vector.load %arg8[%c0_45, %c0_46] : memref<96x128xbf16, #tpu.memory_space<vmem>>, vector<96x128xbf16>
    %cst_47 = arith.constant dense<0.000000e+00> : vector<2x128xf32>
    %95 = tpu.matmul %93, %94, %cst_47 {dimension_numbers = #tpu.dot_dimension_numbers<[1], [0], [0], [1], [0, 0, 1, 1], [], []>} : vector<2x96xbf16>, vector<96x128xbf16>, vector<2x128xf32> -> vector<2x128xf32>
    %c0_48 = arith.constant 0 : index
    %c0_49 = arith.constant 0 : index
    %96 = vector.load %arg9[%c0_48, %c0_49] : memref<1x128xf32, #tpu.memory_space<vmem>>, vector<1x128xf32>
    %97 = vector.broadcast %96 : vector<1x128xf32> to vector<2x128xf32>
    %98 = arith.addf %95, %97 : vector<2x128xf32>
    %99 = vector.extract_strided_slice %98 {offsets = [0, 0], sizes = [2, 32], strides = [1, 1]} : vector<2x128xf32> to vector<2x32xf32>
    %100 = arith.negf %99 : vector<2x32xf32>
    %101 = math.exp %100 : vector<2x32xf32>
    %cst_50 = arith.constant 1.000000e+00 : f32
    %102 = vector.broadcast %cst_50 : f32 to vector<2x32xf32>
    %103 = arith.addf %102, %101 : vector<2x32xf32>
    %104 = arith.divf %102, %103 : vector<2x32xf32>
    %105 = vector.extract_strided_slice %98 {offsets = [0, 32], sizes = [2, 32], strides = [1, 1]} : vector<2x128xf32> to vector<2x32xf32>
    %106 = arith.negf %105 : vector<2x32xf32>
    %107 = math.exp %106 : vector<2x32xf32>
    %cst_51 = arith.constant 1.000000e+00 : f32
    %108 = vector.broadcast %cst_51 : f32 to vector<2x32xf32>
    %109 = arith.addf %108, %107 : vector<2x32xf32>
    %110 = arith.divf %108, %109 : vector<2x32xf32>
    %111 = vector.extract_strided_slice %98 {offsets = [0, 64], sizes = [2, 32], strides = [1, 1]} : vector<2x128xf32> to vector<2x32xf32>
    %112 = math.tanh %111 : vector<2x32xf32>
    %113 = vector.extract_strided_slice %98 {offsets = [0, 96], sizes = [2, 32], strides = [1, 1]} : vector<2x128xf32> to vector<2x32xf32>
    %114 = arith.negf %113 : vector<2x32xf32>
    %115 = math.exp %114 : vector<2x32xf32>
    %cst_52 = arith.constant 1.000000e+00 : f32
    %116 = vector.broadcast %cst_52 : f32 to vector<2x32xf32>
    %117 = arith.addf %116, %115 : vector<2x32xf32>
    %118 = arith.divf %116, %117 : vector<2x32xf32>
    %119 = arith.mulf %110, %60 : vector<2x32xf32>
    %120 = arith.mulf %104, %112 : vector<2x32xf32>
    %121 = arith.addf %119, %120 : vector<2x32xf32>
    %122 = math.tanh %121 : vector<2x32xf32>
    %123 = arith.mulf %118, %122 : vector<2x32xf32>
    %c2 = arith.constant 2 : index
    %c0_53 = arith.constant 0 : index
    %c0_54 = arith.constant 0 : index
    %124 = vector.load %arg7[%c2, %c0_53, %c0_54] : memref<3x2x32xf32, #tpu.memory_space<vmem>>, vector<1x2x32xf32>
    %125 = vector.shape_cast %124 : vector<1x2x32xf32> to vector<2x32xf32>
    %c1_55 = arith.constant 1 : index
    %c0_56 = arith.constant 0 : index
    %c0_57 = arith.constant 0 : index
    %126 = vector.load %arg5[%c1_55, %c0_56, %c0_57] : memref<2x32x32xbf16, #tpu.memory_space<vmem>>, vector<1x32x32xbf16>
    %127 = vector.shape_cast %126 : vector<1x32x32xbf16> to vector<32x32xbf16>
    %128 = vector.extract_strided_slice %125 {offsets = [0, 0], sizes = [1, 32], strides = [1, 1]} : vector<2x32xf32> to vector<1x32xf32>
    %c1_58 = arith.constant 1 : index
    %c0_59 = arith.constant 0 : index
    %c0_60 = arith.constant 0 : index
    %129 = vector.load %arg6[%c1_58, %c0_59, %c0_60] : memref<2x32x32xbf16, #tpu.memory_space<vmem>>, vector<1x32x32xbf16>
    %130 = vector.shape_cast %129 : vector<1x32x32xbf16> to vector<32x32xbf16>
    %131 = vector.extract_strided_slice %125 {offsets = [1, 0], sizes = [1, 32], strides = [1, 1]} : vector<2x32xf32> to vector<1x32xf32>
    %132 = arith.truncf %87 : vector<2x16x32xf32> to vector<2x16x32xbf16>
    "tpu.trace_start"() <{level = 10 : i32, message = "bij,bjc->bic"}> : () -> ()
    %cst_61 = arith.constant dense<0.000000e+00> : vector<2x16x32xf32>
    %133 = tpu.matmul %0, %132, %cst_61 {dimension_numbers = #tpu.dot_dimension_numbers<[2], [1], [1], [2], [0, 0, 0, 1, 1, 2], [0], [0]>} : vector<2x16x16xbf16>, vector<2x16x32xbf16>, vector<2x16x32xf32> -> vector<2x16x32xf32>
    "tpu.trace_stop"() : () -> ()
    %134 = arith.addf %87, %133 : vector<2x16x32xf32>
    %135 = vector.shape_cast %134 : vector<2x16x32xf32> to vector<32x32xf32>
    %136 = arith.truncf %135 : vector<32x32xf32> to vector<32x32xbf16>
    %cst_62 = arith.constant dense<0.000000e+00> : vector<32x32xf32>
    %137 = tpu.matmul %136, %127, %cst_62 {dimension_numbers = #tpu.dot_dimension_numbers<[1], [0], [0], [1], [0, 0, 1, 1], [], []>} : vector<32x32xbf16>, vector<32x32xbf16>, vector<32x32xf32> -> vector<32x32xf32>
    %138 = vector.broadcast %128 : vector<1x32xf32> to vector<32x32xf32>
    %139 = arith.addf %137, %138 : vector<32x32xf32>
    %cst_63 = arith.constant 0.000000e+00 : f32
    %140 = vector.broadcast %cst_63 : f32 to vector<32x32xf32>
    %141 = arith.maximumf %139, %140 : vector<32x32xf32>
    %142 = arith.truncf %141 : vector<32x32xf32> to vector<32x32xbf16>
    %cst_64 = arith.constant dense<0.000000e+00> : vector<32x32xf32>
    %143 = tpu.matmul %142, %130, %cst_64 {dimension_numbers = #tpu.dot_dimension_numbers<[1], [0], [0], [1], [0, 0, 1, 1], [], []>} : vector<32x32xbf16>, vector<32x32xbf16>, vector<32x32xf32> -> vector<32x32xf32>
    %144 = vector.broadcast %131 : vector<1x32xf32> to vector<32x32xf32>
    %145 = arith.addf %143, %144 : vector<32x32xf32>
    %cst_65 = arith.constant 0.000000e+00 : f32
    %146 = vector.broadcast %cst_65 : f32 to vector<32x32xf32>
    %147 = arith.maximumf %145, %146 : vector<32x32xf32>
    %148 = vector.shape_cast %147 : vector<32x32xf32> to vector<2x16x32xf32>
    %cst_66 = arith.constant dense<0.000000e+00> : vector<2x32xf32>
    %149 = vector.multi_reduction <add>, %148, %cst_66 [1] : vector<2x16x32xf32> to vector<2x32xf32>
    %cst_67 = arith.constant 1.600000e+01 : f32
    %150 = vector.broadcast %cst_67 : f32 to vector<2x32xf32>
    %151 = arith.divf %149, %150 : vector<2x32xf32>
    %cst_68 = arith.constant dense<0xFF800000> : vector<2x32xf32>
    %152 = vector.multi_reduction <maximumf>, %148, %cst_68 [1] : vector<2x16x32xf32> to vector<2x32xf32>
    %153 = tpu.concatenate %151, %152, %123 in 1 : vector<2x32xf32>, vector<2x32xf32>, vector<2x32xf32> -> vector<2x96xf32>
    %154 = arith.truncf %153 : vector<2x96xf32> to vector<2x96xbf16>
    %c0_69 = arith.constant 0 : index
    %c0_70 = arith.constant 0 : index
    %155 = vector.load %arg8[%c0_69, %c0_70] : memref<96x128xbf16, #tpu.memory_space<vmem>>, vector<96x128xbf16>
    %cst_71 = arith.constant dense<0.000000e+00> : vector<2x128xf32>
    %156 = tpu.matmul %154, %155, %cst_71 {dimension_numbers = #tpu.dot_dimension_numbers<[1], [0], [0], [1], [0, 0, 1, 1], [], []>} : vector<2x96xbf16>, vector<96x128xbf16>, vector<2x128xf32> -> vector<2x128xf32>
    %c0_72 = arith.constant 0 : index
    %c0_73 = arith.constant 0 : index
    %157 = vector.load %arg9[%c0_72, %c0_73] : memref<1x128xf32, #tpu.memory_space<vmem>>, vector<1x128xf32>
    %158 = vector.broadcast %157 : vector<1x128xf32> to vector<2x128xf32>
    %159 = arith.addf %156, %158 : vector<2x128xf32>
    %160 = vector.extract_strided_slice %159 {offsets = [0, 0], sizes = [2, 32], strides = [1, 1]} : vector<2x128xf32> to vector<2x32xf32>
    %161 = arith.negf %160 : vector<2x32xf32>
    %162 = math.exp %161 : vector<2x32xf32>
    %cst_74 = arith.constant 1.000000e+00 : f32
    %163 = vector.broadcast %cst_74 : f32 to vector<2x32xf32>
    %164 = arith.addf %163, %162 : vector<2x32xf32>
    %165 = arith.divf %163, %164 : vector<2x32xf32>
    %166 = vector.extract_strided_slice %159 {offsets = [0, 32], sizes = [2, 32], strides = [1, 1]} : vector<2x128xf32> to vector<2x32xf32>
    %167 = arith.negf %166 : vector<2x32xf32>
    %168 = math.exp %167 : vector<2x32xf32>
    %cst_75 = arith.constant 1.000000e+00 : f32
    %169 = vector.broadcast %cst_75 : f32 to vector<2x32xf32>
    %170 = arith.addf %169, %168 : vector<2x32xf32>
    %171 = arith.divf %169, %170 : vector<2x32xf32>
    %172 = vector.extract_strided_slice %159 {offsets = [0, 64], sizes = [2, 32], strides = [1, 1]} : vector<2x128xf32> to vector<2x32xf32>
    %173 = math.tanh %172 : vector<2x32xf32>
    %174 = vector.extract_strided_slice %159 {offsets = [0, 96], sizes = [2, 32], strides = [1, 1]} : vector<2x128xf32> to vector<2x32xf32>
    %175 = arith.negf %174 : vector<2x32xf32>
    %176 = math.exp %175 : vector<2x32xf32>
    %cst_76 = arith.constant 1.000000e+00 : f32
    %177 = vector.broadcast %cst_76 : f32 to vector<2x32xf32>
    %178 = arith.addf %177, %176 : vector<2x32xf32>
    %179 = arith.divf %177, %178 : vector<2x32xf32>
    %180 = arith.mulf %171, %121 : vector<2x32xf32>
    %181 = arith.mulf %165, %173 : vector<2x32xf32>
    %182 = arith.addf %180, %181 : vector<2x32xf32>
    %183 = math.tanh %182 : vector<2x32xf32>
    %184 = arith.mulf %179, %183 : vector<2x32xf32>
    %c0_77 = arith.constant 0 : index
    %c0_78 = arith.constant 0 : index
    %185 = vector.load %arg10[%c0_77, %c0_78] : memref<32x32xf32, #tpu.memory_space<vmem>>, vector<32x32xf32>
    %cst_79 = arith.constant dense<0.000000e+00> : vector<2x32xf32>
    %186 = tpu.matmul %184, %185, %cst_79 {dimension_numbers = #tpu.dot_dimension_numbers<[1], [0], [0], [1], [0, 0, 1, 1], [], []>} : vector<2x32xf32>, vector<32x32xf32>, vector<2x32xf32> -> vector<2x32xf32>
    %c0_80 = arith.constant 0 : index
    %c0_81 = arith.constant 0 : index
    %187 = vector.load %arg11[%c0_80, %c0_81] : memref<1x32xf32, #tpu.memory_space<vmem>>, vector<1x32xf32>
    %188 = vector.broadcast %187 : vector<1x32xf32> to vector<2x32xf32>
    %189 = arith.addf %186, %188 : vector<2x32xf32>
    %cst_82 = arith.constant 0.000000e+00 : f32
    %190 = vector.broadcast %cst_82 : f32 to vector<2x32xf32>
    %191 = arith.maximumf %189, %190 : vector<2x32xf32>
    %c0_83 = arith.constant 0 : index
    %c0_84 = arith.constant 0 : index
    %192 = vector.load %arg12[%c0_83, %c0_84] : memref<32x4xf32, #tpu.memory_space<vmem>>, vector<32x4xf32>
    %cst_85 = arith.constant dense<0.000000e+00> : vector<2x4xf32>
    %193 = tpu.matmul %191, %192, %cst_85 {dimension_numbers = #tpu.dot_dimension_numbers<[1], [0], [0], [1], [0, 0, 1, 1], [], []>} : vector<2x32xf32>, vector<32x4xf32>, vector<2x4xf32> -> vector<2x4xf32>
    %c0_86 = arith.constant 0 : index
    %c0_87 = arith.constant 0 : index
    %194 = vector.load %arg13[%c0_86, %c0_87] : memref<1x4xf32, #tpu.memory_space<vmem>>, vector<1x4xf32>
    %195 = vector.broadcast %194 : vector<1x4xf32> to vector<2x4xf32>
    %196 = arith.addf %193, %195 : vector<2x4xf32>
    %c0_88 = arith.constant 0 : index
    %c0_89 = arith.constant 0 : index
    %c0_90 = arith.constant 0 : index
    %197 = vector.load %arg14[%c0_88, %c0_89, %c0_90] : memref<1x2x4xf32, #tpu.memory_space<vmem>>, vector<1x2x4xf32>
    %198 = vector.shape_cast %197 : vector<1x2x4xf32> to vector<2x4xf32>
    %199 = vector.shape_cast %196 : vector<2x4xf32> to vector<1x2x4xf32>
    tpu.vector_store %arg14[%c0_88, %c0_89, %c0_90], %199 {strides = array<i32>} : memref<1x2x4xf32, #tpu.memory_space<vmem>>, vector<1x2x4xf32>,
    return
  }
  func.func @transform_0(%arg0: i32) -> (i32, i32, i32) {
    %c0_i32 = arith.constant 0 : i32
    %c0_i32_0 = arith.constant 0 : i32
    %c0_i32_1 = arith.constant 0 : i32
    return %arg0, %c0_i32, %c0_i32_0 : i32, i32, i32
  }
  func.func @transform_1(%arg0: i32) -> (i32, i32, i32) {
    %c0_i32 = arith.constant 0 : i32
    %c0_i32_0 = arith.constant 0 : i32
    %c0_i32_1 = arith.constant 0 : i32
    return %arg0, %c0_i32, %c0_i32_0 : i32, i32, i32
  }
  func.func @transform_2(%arg0: i32) -> (i32, i32) {
    %c0_i32 = arith.constant 0 : i32
    %c0_i32_0 = arith.constant 0 : i32
    %c0_i32_1 = arith.constant 0 : i32
    return %c0_i32, %c0_i32_0 : i32, i32
  }
  func.func @transform_3(%arg0: i32) -> (i32, i32) {
    %c0_i32 = arith.constant 0 : i32
    %c0_i32_0 = arith.constant 0 : i32
    %c0_i32_1 = arith.constant 0 : i32
    return %c0_i32, %c0_i32_0 : i32, i32
  }
  func.func @transform_4(%arg0: i32) -> (i32, i32, i32) {
    %c0_i32 = arith.constant 0 : i32
    %c0_i32_0 = arith.constant 0 : i32
    %c0_i32_1 = arith.constant 0 : i32
    %c0_i32_2 = arith.constant 0 : i32
    return %c0_i32, %c0_i32_0, %c0_i32_1 : i32, i32, i32
  }
  func.func @transform_5(%arg0: i32) -> (i32, i32, i32) {
    %c0_i32 = arith.constant 0 : i32
    %c0_i32_0 = arith.constant 0 : i32
    %c0_i32_1 = arith.constant 0 : i32
    %c0_i32_2 = arith.constant 0 : i32
    return %c0_i32, %c0_i32_0, %c0_i32_1 : i32, i32, i32
  }
  func.func @transform_6(%arg0: i32) -> (i32, i32, i32) {
    %c0_i32 = arith.constant 0 : i32
    %c0_i32_0 = arith.constant 0 : i32
    %c0_i32_1 = arith.constant 0 : i32
    %c0_i32_2 = arith.constant 0 : i32
    return %c0_i32, %c0_i32_0, %c0_i32_1 : i32, i32, i32
  }
  func.func @transform_7(%arg0: i32) -> (i32, i32) {
    %c0_i32 = arith.constant 0 : i32
    %c0_i32_0 = arith.constant 0 : i32
    %c0_i32_1 = arith.constant 0 : i32
    return %c0_i32, %c0_i32_0 : i32, i32
  }
  func.func @transform_8(%arg0: i32) -> (i32, i32) {
    %c0_i32 = arith.constant 0 : i32
    %c0_i32_0 = arith.constant 0 : i32
    %c0_i32_1 = arith.constant 0 : i32
    return %c0_i32, %c0_i32_0 : i32, i32
  }
  func.func @transform_9(%arg0: i32) -> (i32, i32) {
    %c0_i32 = arith.constant 0 : i32
    %c0_i32_0 = arith.constant 0 : i32
    %c0_i32_1 = arith.constant 0 : i32
    return %c0_i32, %c0_i32_0 : i32, i32
  }
  func.func @transform_10(%arg0: i32) -> (i32, i32) {
    %c0_i32 = arith.constant 0 : i32
    %c0_i32_0 = arith.constant 0 : i32
    %c0_i32_1 = arith.constant 0 : i32
    return %c0_i32, %c0_i32_0 : i32, i32
  }
  func.func @transform_11(%arg0: i32) -> (i32, i32) {
    %c0_i32 = arith.constant 0 : i32
    %c0_i32_0 = arith.constant 0 : i32
    %c0_i32_1 = arith.constant 0 : i32
    return %c0_i32, %c0_i32_0 : i32, i32
  }
  func.func @transform_12(%arg0: i32) -> (i32, i32) {
    %c0_i32 = arith.constant 0 : i32
    %c0_i32_0 = arith.constant 0 : i32
    %c0_i32_1 = arith.constant 0 : i32
    return %c0_i32, %c0_i32_0 : i32, i32
  }
  func.func @transform_13(%arg0: i32) -> (i32, i32, i32) {
    %c0_i32 = arith.constant 0 : i32
    %c0_i32_0 = arith.constant 0 : i32
    %c0_i32_1 = arith.constant 0 : i32
    return %arg0, %c0_i32, %c0_i32_0 : i32, i32, i32
  }
}

</mosaic_0001>

<bundles_post_ra>
// kernel: model_forward.1
= control target key start
LH: loop header
LB: loop body
LE: loop exit
PB: predicated region body
PF: predicated region fallthrough
CT: control target
= control target key end

     0   :  { %v1924_v2 = vmov 0.0   ;;  %vm1925_vm0 = vmmov 0   ;;  %vm67_vm1 = vcmask 130048   ;;  %s2369_s0 = inlined_call_operand.vmem [shape: bf16[2,16,16], index: 0, kind: input, shape index: {}]   ;;  %s2370_s1 = inlined_call_operand.vmem [shape: f32[2,16,8], index: 1, kind: input, shape index: {}]   ;;  %s2371_s2 = inlined_call_operand.vmem [shape: bf16[8,32], index: 2, kind: input, shape index: {}]   ;;  %s2372_s3 = inlined_call_operand.vmem [shape: bf16[32,32], index: 3, kind: input, shape index: {}]   ;;  %s2373_s4 = inlined_call_operand.vmem [shape: bf16[2,32,32], index: 4, kind: input, shape index: {}]   ;;  %s2374_s5 = inlined_call_operand.vmem [shape: bf16[2,32,32], index: 5, kind: input, shape index: {}]   ;;  %s2375_s6 = inlined_call_operand.vmem [shape: f32[3,2,32], index: 6, kind: input, shape index: {}]   ;;  %s2376_s7 = inlined_call_operand.vmem [shape: bf16[96,128], index: 7, kind: input, shape index: {}]   ;;  %s2377_s8 = inlined_call_operand.vmem [shape: f32[1,128], index: 8, kind: input, shape index: {}]   ;;  %s2378_s9 = inlined_call_operand.vmem [shape: f32[32,32], index: 9, kind: input, shape index: {}]   ;;  %s2379_s10 = inlined_call_operand.vmem [shape: f32[1,32], index: 10, kind: input, shape index: {}]   ;;  %s2380_s11 = inlined_call_operand.vmem [shape: f32[32,4], index: 11, kind: input, shape index: {}]   ;;  %s2381_s12 = inlined_call_operand.vmem [shape: f32[1,4], index: 12, kind: input, shape index: {}]   ;;  %s2382_s13 = inlined_call_operand.hbm [shape: f32[1,2,4], index: 13, kind: output, shape index: {}]  }
   0x1   :  { %v50_v0 = vld [vmem:[%s2370_s1] sm:$0xff]  ;;  %v51_v1 = vld [vmem:[%s2370_s1 + $0x8] sm:$0xff]  ;;  %1674 = vmatprep.subr.bf16.mxu1 %v1924_v2  ;;  %1676 = vmatprep.mubr.msk.bf16.mxu1 %vm1925_vm0, %v1924_v2  ;;  %v52_v5 = vld [vmem:[%s2370_s1 + $0x10] sm:$0xff] }
   0x2   :  { %v60_v3 = vpack.c.bf16 %v51_v1, %v50_v0  ;;  %v2013_v4 = vld [vmem:[%s2369_s0] sm:$0xff]   ;;  %v53_v6 = vld [vmem:[%s2370_s1 + $0x18] sm:$0xff]  ;;  %v2029_v8 = vld [vmem:[%s2369_s0 + $0x8] sm:$0xff]  }
   0x3   :  { %v61_v7 = vpack.c.bf16 %v53_v6, %v52_v5 }
   0x4   :  { %1675 = vmatpush3.bf16.msra.mxu1 %v60_v3 }
   0x5   :  { %1680 = vmatprep.subr.bf16.mxu1 %v1924_v2 }
   0x7   :  { %1677 = vmatmul.mubr.msk.bf16.vlgmr.msra.gmra.mrb[0].mxu1 %vm67_vm1, %v2013_v4 }
   0x8   :  { %1681 = vmatpush3.bf16.msra.mxu1 %v61_v7  ;;  %1682 = vmatprep.mubr.msk.bf16.mxu1 %vm1925_vm0, %v1924_v2 }
   0xf   :  { %1683 = vmatmul.mubr.msk.bf16.vlgmr.msra.gmra.mrb[4].mxu1 %vm67_vm1, %v2029_v8 }
  0x10   :  { %18 = vsyncpa [#allocation3], 0  ;;  %v55_v9 = vld [vmem:[%s2371_s2] sm:$0xf]  ;;  %vm178_vm2 = vcmask 1043456   ;;  %vm171_vm3 = vcmask 64512   ;;  %v167_v27 = vlaneseq }
  0x11   :  { %1838 = vmatprep.subr.msk.bf16.mxu0 %vm178_vm2, %v55_v9  ;;  %v180_v10 = vsel %vm178_vm2, %v55_v9, 0  ;;  %v1848_v25 = vld [vmem:[%s2372_s3] sm:$0xff]   ;;  %v1849_v26 = vld [vmem:[%s2372_s3 + $0x8] sm:$0xff]   ;;  %vm253_vm4 = vcmask 261120   ;;  %v1852_v48 = vld [vmem:[%s2376_s7 + $0x10] sm:$0xff]   ;;  %vm354_vm5 = vcmask 1041409  }
  0x12   :  { %1687 = vmatpush3.bf16.msra.mxu0 %v180_v10  ;;  %1692 = vmatprep.subr.bf16.mxu1 %v1848_v25  ;;  %v168_v28 = vshrl.u32 %v167_v27, 7  ;;  %v54_v30 = vld [vmem:[%s2375_s6] sm:$0x3]  ;;  %v1851_v47 = vld [vmem:[%s2376_s7 + $0x8] sm:$0xff]   ;;  %v1853_v49 = vld [vmem:[%s2376_s7 + $0x18] sm:$0xff]   ;;  %s1926_s19 = smov 32  }
  0x13   :  { %1700 = vmatprep.subr.bf16.mxu0 %v1924_v2  ;;  %1693 = vmatpush3.bf16.msra.mxu1 %v1848_v25  ;;  %v1850_v46 = vld [vmem:[%s2376_s7] sm:$0xff]   ;;  %vm364_vm6 = vcmask 523264   ;;  %vm422_vm7 = vcmask 785408   ;;  %s1927_s26 = smov 64   ;;  %s1928_s21 = smov 96   ;;  %vm1521_vm8 = vcmask 25600  }
  0x14   :  { %1694 = vmatprep.subr.bf16.mxu1 %v1849_v26  ;;  %v2046_v29 = vsub.s32 0, %v168_v28  ;;  %v1854_v50 = vld [vmem:[%s2376_s7 + $0x20] sm:$0xff]   ;;  %v2076_v51 = vsub.s32 1, %v168_v28  ;;  %s1930_s16 = smov [#allocation2]  }
  0x15   :  { %s1529_s17 = sshll.u32 %s1930_s16, 4  ;;  %s1530_s17 = int_to_ptr.vmem [resolvable:$true] %s1529_s17 }
  0x16   :  { %v170_v31 = vrot.slane %v54_v30, %v2046_v29  ;;  %v240_v52 = vrot.slane %v54_v30, %v2076_v51  ;;  %p1905_p1 = scmp.lt.s32.totalorder %s1530_s17, %s1530_s17 }
  0x17   :  { %1695 = vmatpush3.bf16.msra.mxu1 %v1849_v26  ;;  %v1856_v26 = vld [vmem:[%s2373_s4] sm:$0xff]  }
  0x18   :  { %1716 = vmatprep.subr.bf16.mxu1 %v1924_v2 }
  0xda   :  { %v105_v11 = vpop.f32.mrb[0].mxu1 }
  0xdb   :  { %v1678_v12 = vpop.f32.mrb[1].mxu1  ;;  %v161_v14 = vadd.f32 %v105_v11, %v50_v0 }
  0xdc   :  { %v108_v13 = vpop.f32.mrb[2].mxu1 }
  0xdd   :  { %v162_v15 = vadd.f32 %v108_v13, %v51_v1  ;;  %v1679_v16 = vpop.f32.mrb[3].mxu1  ;;  %v1855_v13 = vld [vmem:[%s2376_s7 + $0x28] sm:$0xff]  }
  0xdf   :  { %v165_v17 = vpack.c.bf16 %v162_v15, %v161_v14 }
  0xe1   :  { %1688 = vmatprep.mubr.msk.bf16.mxu0 %vm171_vm3, %v165_v17 }
  0xe2   :  { %v154_v18 = vpop.f32.mrb[4].mxu1 }
  0xe3   :  { %v1684_v19 = vpop.f32.mrb[5].mxu1  ;;  %v163_v21 = vadd.f32 %v154_v18, %v52_v5 }
  0xe4   :  { %v157_v20 = vpop.f32.mrb[6].mxu1 }
  0xe5   :  { %v164_v22 = vadd.f32 %v157_v20, %v53_v6  ;;  %v1685_v23 = vpop.f32.mrb[7].mxu1 }
  0xe7   :  { %v166_v24 = vpack.c.bf16 %v164_v22, %v163_v21 }
  0xe9   :  { %1689 = vmatmul.mubr.msk.bf16.vlgmr.msra.gmra.mrb[0].mxu0 %vm171_vm3, %v166_v24 }
  0xea   :  { %1712 = vmatprep.mubr.msk.bf16.mxu0 %vm1925_vm0, %v1924_v2  ;;  %1701 = vmatpush3.bf16.msra.mxu0 %v1850_v46 }
  0xeb   :  { %1702 = vmatprep.subr.bf16.mxu0 %v1924_v2 }
  0xee   :  { %1703 = vmatpush3.bf16.msra.mxu0 %v1851_v47 }
  0xef   :  { %1704 = vmatprep.subr.bf16.mxu0 %v1924_v2 }
  0xf2   :  { %1705 = vmatpush3.bf16.msra.mxu0 %v1852_v48 }
  0xf3   :  { %1706 = vmatprep.subr.bf16.mxu0 %v1924_v2 }
  0xf6   :  { %1707 = vmatpush3.bf16.msra.mxu0 %v1853_v49 }
  0xf7   :  { %1708 = vmatprep.subr.bf16.mxu0 %v1924_v2 }
  0xfa   :  { %1709 = vmatpush3.bf16.msra.mxu0 %v1854_v50 }
  0xfb   :  { %1710 = vmatprep.subr.bf16.mxu0 %v1924_v2 }
  0xfe   :  { %1711 = vmatpush3.bf16.msra.mxu0 %v1855_v13 }
 0x1bc   :  { %v1690_v32 = vpop.f32.mrb[0].mxu0 }
 0x1bd   :  { %v225_v33 = vadd.f32 %v1690_v32, %v170_v31  ;;  %v216_v34 = vpop.f32.mrb[1].mxu0 }
 0x1be   :  { %v217_v35 = vadd.f32 %v216_v34, %v170_v31  ;;  %v1691_v36 = vpop.f32.mrb[2].mxu0  ;;  %v1857_v34 = vld [vmem:[%s2373_s4 + $0x8] sm:$0xff]  }
 0x1bf   :  { %v228_v37 = vadd.f32 %v1691_v36, %v170_v31  ;;  %v219_v38 = vpop.f32.mrb[3].mxu0  ;;  %v233_v40 = vmax.f32 %v225_v33, 0.0 }
 0x1c0   :  { %v220_v39 = vadd.f32 %v219_v38, %v170_v31  ;;  %v231_v42 = vmax.f32 %v217_v35, 0.0 }
 0x1c1   :  { %v234_v41 = vmax.f32 %v228_v37, 0.0 }
 0x1c2   :  { %v232_v43 = vmax.f32 %v220_v39, 0.0 }
 0x1c3   :  { %v236_v44 = vpack.c.bf16 %v234_v41, %v233_v40 }
 0x1c4   :  { %v235_v45 = vpack.c.bf16 %v232_v43, %v231_v42 }
 0x1c6   :  { %1696 = vmatprep.mubr.msk.bf16.mxu1 %vm253_vm4, %v235_v45 }
 0x1c7   :  { %1697 = vmatmul.mubr.msk.bf16.vlgmr.msra.gmra.mrb[8].mxu1 %vm253_vm4, %v236_v44 }
 0x1c8   :  { %1718 = vmatprep.mubr.msk.bf16.mxu1 %vm1925_vm0, %v1924_v2 }
 0x29a   :  { %v1698_v53 = vpop.f32.mrb[8].mxu1 }
 0x29b   :  { %v303_v54 = vadd.f32 %v1698_v53, %v240_v52  ;;  %v294_v55 = vpop.f32.mrb[9].mxu1 }
 0x29c   :  { %v295_v56 = vadd.f32 %v294_v55, %v240_v52  ;;  %v1699_v57 = vpop.f32.mrb[10].mxu1 }
 0x29d   :  { %v2079_v58 = vmax.f32 %v303_v54, 0.0  ;;  %v306_v59 = vadd.f32 %v1699_v57, %v240_v52  ;;  %v297_v60 = vpop.f32.mrb[11].mxu1 }
 0x29e   :  { %v2081_v61 = vmax.f32 %v295_v56, 0.0  ;;  %v298_v62 = vadd.f32 %v297_v60, %v240_v52 }
 0x29f   :  { %v2083_v63 = vmax.f32 %v306_v59, 0.0  ;;  %v343_v1 = vsel %vm253_vm4, %v2079_v58, -inf  ;;  %v322_v30 = vsel %vm253_vm4, %v2079_v58, 0.0 }
 0x2a0   :  { %v2085_v0 = vmax.f32 %v298_v62, 0.0  ;;  %v334_v5 = vsel %vm253_vm4, %v2081_v61, -inf  ;;  %v313_v31 = vsel %vm253_vm4, %v2081_v61, 0.0 }
 0x2a1   :  { %v344_v3 = vsel %vm253_vm4, %v2083_v63, -inf  ;;  %v501_v15 = vpack.c.bf16 %v2083_v63, %v2079_v58  ;;  %v323_v27 = vsel %vm253_vm4, %v2083_v63, 0.0 }
 0x2a2   :  { %v345_v6 = vmax.f32 %v343_v1, %v344_v3  ;;  %v335_v7 = vsel %vm253_vm4, %v2085_v0, -inf  ;;  %v500_v10 = vpack.c.bf16 %v2085_v0, %v2081_v61  ;;  %v314_v28 = vsel %vm253_vm4, %v2085_v0, 0.0 }
 0x2a3   :  { %v336_v9 = vmax.f32 %v334_v5, %v335_v7  ;;  %v324_v32 = vadd.f32 %v323_v27, %v322_v30  ;;  %v315_v33 = vadd.f32 %v314_v28, %v313_v31 }
 0x2a4   :  { %v346_v11 = vrot.slane %v345_v6, 4  ;;  %1717 = vmatpush3.bf16.msra.mxu1 %v500_v10 }
 0x2a5   :  { %v337_v12 = vrot.slane %v336_v9, 4  ;;  %1722 = vmatprep.subr.bf16.mxu1 %v1924_v2  ;;  %v325_v35 = vrot.slane %v324_v32, 4  ;;  %v316_v36 = vrot.slane %v315_v33, 4 }
 0x2a6   :  { %v347_v14 = vmax.f32 %v345_v6, %v346_v11 }
 0x2a7   :  { %v338_v16 = vmax.f32 %v336_v9, %v337_v12  ;;  %1719 = vmatmul.mubr.msk.bf16.vlgmr.msra.gmra.mrb[12].mxu1 %vm67_vm1, %v2013_v4  ;;  %v326_v37 = vadd.f32 %v325_v35, %v324_v32  ;;  %v317_v38 = vadd.f32 %v316_v36, %v315_v33 }
 0x2a8   :  { %v348_v17 = vrot.slane %v347_v14, 2  ;;  %1723 = vmatpush3.bf16.msra.mxu1 %v501_v15  ;;  %1724 = vmatprep.mubr.msk.bf16.mxu1 %vm1925_vm0, %v1924_v2 }
 0x2a9   :  { %v339_v18 = vrot.slane %v338_v16, 2  ;;  %1728 = vmatprep.subr.bf16.mxu1 %v1856_v26  ;;  %v327_v39 = vrot.slane %v326_v37, 2  ;;  %v318_v40 = vrot.slane %v317_v38, 2 }
 0x2aa   :  { %v349_v19 = vmax.f32 %v347_v14, %v348_v17  ;;  %v1556_v17 = vld [vmem:[%s2375_s6 + $0x2] sm:$0x3] }
 0x2ab   :  { %v340_v20 = vmax.f32 %v338_v16, %v339_v18  ;;  %v328_v41 = vadd.f32 %v327_v39, %v326_v37  ;;  %v319_v42 = vadd.f32 %v318_v40, %v317_v38  ;;  %v593_v18 = vrot.slane %v1556_v17, %v2046_v29 }
 0x2ac   :  { %v350_v21 = vrot.slane %v349_v19, 1 }
 0x2ad   :  { %v341_v22 = vrot.slane %v340_v20, 1  ;;  %v329_v43 = vrot.slane %v328_v41, 1  ;;  %v320_v44 = vrot.slane %v319_v42, 1 }
 0x2ae   :  { %v351_v23 = vmax.f32 %v349_v19, %v350_v21 }
 0x2af   :  { %v342_v24 = vmax.f32 %v340_v20, %v341_v22  ;;  %1725 = vmatmul.mubr.msk.bf16.vlgmr.msra.gmra.mrb[16].mxu1 %vm67_vm1, %v2029_v8  ;;  %v330_v45 = vadd.f32 %v329_v43, %v328_v41  ;;  %v321_v46 = vadd.f32 %v320_v44, %v319_v42  ;;  %v670_v44 = vrot.slane %v1556_v17, %v2076_v51 }
 0x2b0   :  { %1729 = vmatpush3.bf16.msra.mxu1 %v1856_v26 }
 0x2b1   :  { %v359_v25 = vsel %vm354_vm5, %v351_v23, %v342_v24  ;;  %1730 = vmatprep.subr.bf16.mxu1 %v1857_v34  ;;  %v333_v47 = vmul.f32 0.0625, %v330_v45  ;;  %v332_v48 = vmul.f32 0.0625, %v321_v46 }
 0x2b2   :  { %360 = vrot.lane.b32.xlu0 %v359_v25, %s1926_s19 }
 0x2b3   :  { %v355_v50 = vsel %vm354_vm5, %v333_v47, %v332_v48 }
 0x2b4   :  { %1731 = vmatpush3.bf16.msra.mxu1 %v1857_v34 }
 0x2b5   :  { %1744 = vmatprep.subr.bf16.mxu1 %v1924_v2 }
 0x324   :  { %v361_v49 = vpop.permute.xlu0 %360 }
 0x325   :  { %v363_v52 = vsel %vm253_vm4, %v355_v50, %v361_v49 }
 0x326   :  { %v365_v53 = vsel %vm364_vm6, %v363_v52, 0.0 }
 0x327   :  { %v366_v54 = vpack.c.bf16 %v365_v53, %v365_v53 }
 0x329   :  { %1713 = vmatmul.mubr.msk.bf16.vlgmr.msra.gmra.mrb[4].mxu0 %vm422_vm7, %v366_v54 }
 0x37a   :  { %v536_v55 = vpop.f32.mrb[12].mxu1 }
 0x37b   :  { %v1720_v56 = vpop.f32.mrb[13].mxu1  ;;  %v584_v59 = vadd.f32 %v536_v55, %v2081_v61  ;;  %v1858_v61 = vld [vmem:[%s2374_s5] sm:$0xff]  }
 0x37c   :  { %v539_v57 = vpop.f32.mrb[14].mxu1  ;;  %1736 = vmatprep.subr.bf16.mxu0 %v1858_v61 }
 0x37d   :  { %v585_v60 = vadd.f32 %v539_v57, %v2085_v0  ;;  %v1721_v62 = vpop.f32.mrb[15].mxu1  ;;  %1737 = vmatpush3.bf16.msra.mxu0 %v1858_v61  ;;  %v1859_v0 = vld [vmem:[%s2374_s5 + $0x8] sm:$0xff]  }
 0x37e   :  { %1738 = vmatprep.subr.bf16.mxu0 %v1859_v0 }
 0x37f   :  { %v588_v1 = vpack.c.bf16 %v585_v60, %v584_v59 }
 0x381   :  { %1732 = vmatprep.mubr.msk.bf16.mxu1 %vm253_vm4, %v588_v1  ;;  %1739 = vmatpush3.bf16.msra.mxu0 %v1859_v0 }
 0x382   :  { %v577_v3 = vpop.f32.mrb[16].mxu1  ;;  %1760 = vmatprep.subr.bf16.mxu0 %v1924_v2 }
 0x383   :  { %v1726_v5 = vpop.f32.mrb[17].mxu1  ;;  %v586_v7 = vadd.f32 %v577_v3, %v2079_v58  ;;  %v2148_v58 = vld [vmem:[%s2377_s8] ss:$0 sm:$0xff] }
 0x384   :  { %v580_v6 = vpop.f32.mrb[18].mxu1 }
 0x385   :  { %v587_v9 = vadd.f32 %v580_v6, %v2083_v63  ;;  %v1727_v10 = vpop.f32.mrb[19].mxu1 }
 0x386   :  { %v1860_v10 = vld [vmem:[%s2376_s7] sm:$0xff]  }
 0x387   :  { %v589_v11 = vpack.c.bf16 %v587_v9, %v586_v7 }
 0x389   :  { %1733 = vmatmul.mubr.msk.bf16.vlgmr.msra.gmra.mrb[20].mxu1 %vm253_vm4, %v589_v11 }
 0x38a   :  { %1756 = vmatprep.mubr.msk.bf16.mxu1 %vm1925_vm0, %v1924_v2  ;;  %1745 = vmatpush3.bf16.msra.mxu1 %v1860_v10 }
 0x38b   :  { %1746 = vmatprep.subr.bf16.mxu1 %v1924_v2 }
 0x3fc   :  { %v460_v63 = vpop.f32.mrb[4].mxu0 }
 0x3fd   :  { %v461_v12 = vadd.f32 %v2148_v58, %v460_v63  ;;  %v1714_v13 = vpop.f32.mrb[5].mxu0  ;;  %v1861_v63 = vld [vmem:[%s2376_s7 + $0x8] sm:$0xff]  }
 0x3fe   :  { %v463_v14 = vpop.f32.mrb[6].mxu0  ;;  %1747 = vmatpush3.bf16.msra.mxu1 %v1861_v63 }
 0x3ff   :  { %1876 = vtanh.f32 %v461_v12  ;;  %v1715_v15 = vpop.f32.mrb[7].mxu0  ;;  %v1555_v19 = vmul.f32 -1.442695, %v461_v12  ;;  %1748 = vmatprep.subr.bf16.mxu1 %v1924_v2 }
 0x401   :  { %1878 = vpow2.f32 %v1555_v19 }
 0x409   :  { %v1877_v16 = vpop.eup %1876 }
 0x40a   :  { %475 = vrot.lane.b32.xlu0 %v1877_v16, %s1927_s26  ;;  %v1862_v16 = vld [vmem:[%s2376_s7 + $0x10] sm:$0xff]  }
 0x40b   :  { %v1879_v35 = vpop.eup %1878  ;;  %1749 = vmatpush3.bf16.msra.mxu1 %v1862_v16 }
 0x40c   :  { %v469_v36 = vadd.f32 1.0, %v1879_v35  ;;  %1750 = vmatprep.subr.bf16.mxu1 %v1924_v2 }
 0x40e   :  { %1880 = vrcp.f32 %v469_v36 }
 0x418   :  { %v2160_v37 = vpop.eup %1880 }
 0x419   :  { %v473_v40 = vmul.f32 0.0, %v2160_v37 }
 0x45c   :  { %v1734_v20 = vpop.f32.mrb[20].mxu1 }
 0x45d   :  { %v655_v21 = vadd.f32 %v1734_v20, %v593_v18  ;;  %v646_v22 = vpop.f32.mrb[21].mxu1  ;;  %v1863_v20 = vld [vmem:[%s2376_s7 + $0x18] sm:$0xff]  }
 0x45e   :  { %v647_v23 = vadd.f32 %v646_v22, %v593_v18  ;;  %v1735_v24 = vpop.f32.mrb[22].mxu1  ;;  %1751 = vmatpush3.bf16.msra.mxu1 %v1863_v20  ;;  %v1864_v22 = vld [vmem:[%s2376_s7 + $0x20] sm:$0xff]  }
 0x45f   :  { %v658_v25 = vadd.f32 %v1735_v24, %v593_v18  ;;  %v649_v26 = vpop.f32.mrb[23].mxu1  ;;  %v663_v28 = vmax.f32 %v655_v21, 0.0  ;;  %1752 = vmatprep.subr.bf16.mxu1 %v1924_v2 }
 0x460   :  { %v650_v27 = vadd.f32 %v649_v26, %v593_v18  ;;  %v661_v31 = vmax.f32 %v647_v23, 0.0  ;;  %v1867_v26 = vld [vmem:[%s2373_s4 + $0x18] sm:$0xff]  }
 0x461   :  { %v664_v30 = vmax.f32 %v658_v25, 0.0  ;;  %v1866_v25 = vld [vmem:[%s2373_s4 + $0x10] sm:$0xff]  }
 0x462   :  { %v662_v32 = vmax.f32 %v650_v27, 0.0  ;;  %1753 = vmatpush3.bf16.msra.mxu1 %v1864_v22 }
 0x463   :  { %v666_v33 = vpack.c.bf16 %v664_v30, %v663_v28  ;;  %1754 = vmatprep.subr.bf16.mxu1 %v1924_v2 }
 0x464   :  { %v665_v34 = vpack.c.bf16 %v662_v32, %v661_v31 }
 0x466   :  { %1740 = vmatprep.mubr.msk.bf16.mxu0 %vm253_vm4, %v665_v34 }
 0x467   :  { %1741 = vmatmul.mubr.msk.bf16.vlgmr.msra.gmra.mrb[8].mxu0 %vm253_vm4, %v666_v33 }
 0x468   :  { %1762 = vmatprep.mubr.msk.bf16.mxu0 %vm1925_vm0, %v1924_v2 }
 0x47c   :  { %v476_v38 = vpop.permute.xlu0 %475 }
 0x47d   :  { %v478_v39 = vmul.f32 %v2160_v37, %v476_v38 }
 0x47f   :  { %480 = vrot.lane.b32.xlu1 %v478_v39, %s1926_s19 }
 0x4f1   :  { %v481_v41 = vpop.permute.xlu1 %480 }
 0x4f2   :  { %v2165_v42 = vadd.f32 %v481_v41, %v473_v40 }
 0x4f4   :  { %1882 = vtanh.f32 %v2165_v42 }
 0x4fe   :  { %v1883_v43 = vpop.eup %1882 }
 0x4ff   :  { %486 = vrot.lane.b32.xlu1 %v1883_v43, %s1927_s26 }
 0x53a   :  { %v1742_v45 = vpop.f32.mrb[8].mxu0 }
 0x53b   :  { %v732_v46 = vadd.f32 %v1742_v45, %v670_v44  ;;  %v723_v47 = vpop.f32.mrb[9].mxu0 }
 0x53c   :  { %v724_v48 = vadd.f32 %v723_v47, %v670_v44  ;;  %v1743_v49 = vpop.f32.mrb[10].mxu0 }
 0x53d   :  { %v2170_v50 = vmax.f32 %v732_v46, 0.0  ;;  %v735_v52 = vadd.f32 %v1743_v49, %v670_v44  ;;  %v726_v53 = vpop.f32.mrb[11].mxu0 }
 0x53e   :  { %v2172_v54 = vmax.f32 %v724_v48, 0.0  ;;  %v727_v55 = vadd.f32 %v726_v53, %v670_v44 }
 0x53f   :  { %v2174_v56 = vmax.f32 %v735_v52, 0.0  ;;  %v771_v59 = vsel %vm253_vm4, %v2170_v50, -inf  ;;  %v751_v30 = vsel %vm253_vm4, %v2170_v50, 0.0 }
 0x540   :  { %v2176_v57 = vmax.f32 %v727_v55, 0.0  ;;  %v762_v62 = vsel %vm253_vm4, %v2172_v54, -inf  ;;  %v742_v31 = vsel %vm253_vm4, %v2172_v54, 0.0 }
 0x541   :  { %v772_v60 = vsel %vm253_vm4, %v2174_v56, -inf  ;;  %v932_v61 = vpack.c.bf16 %v2174_v56, %v2170_v50  ;;  %v752_v27 = vsel %vm253_vm4, %v2174_v56, 0.0 }
 0x542   :  { %v773_v1 = vmax.f32 %v771_v59, %v772_v60  ;;  %v763_v3 = vsel %vm253_vm4, %v2176_v57, -inf  ;;  %v931_v6 = vpack.c.bf16 %v2176_v57, %v2172_v54  ;;  %v743_v28 = vsel %vm253_vm4, %v2176_v57, 0.0 }
 0x543   :  { %v764_v5 = vmax.f32 %v762_v62, %v763_v3  ;;  %v753_v32 = vadd.f32 %v752_v27, %v751_v30  ;;  %v744_v33 = vadd.f32 %v743_v28, %v742_v31 }
 0x544   :  { %v774_v7 = vrot.slane %v773_v1, 4  ;;  %1761 = vmatpush3.bf16.msra.mxu0 %v931_v6 }
 0x545   :  { %v765_v9 = vrot.slane %v764_v5, 4  ;;  %1766 = vmatprep.subr.bf16.mxu0 %v1924_v2  ;;  %v754_v34 = vrot.slane %v753_v32, 4  ;;  %v745_v35 = vrot.slane %v744_v33, 4 }
 0x546   :  { %v775_v11 = vmax.f32 %v773_v1, %v774_v7 }
 0x547   :  { %v766_v0 = vmax.f32 %v764_v5, %v765_v9  ;;  %1763 = vmatmul.mubr.msk.bf16.vlgmr.msra.gmra.mrb[12].mxu0 %vm67_vm1, %v2013_v4  ;;  %v755_v36 = vadd.f32 %v754_v34, %v753_v32 }
 0x548   :  { %v776_v12 = vrot.slane %v775_v11, 2  ;;  %1767 = vmatpush3.bf16.msra.mxu0 %v932_v61  ;;  %1768 = vmatprep.mubr.msk.bf16.mxu0 %vm1925_vm0, %v1924_v2 }
 0x549   :  { %v767_v13 = vrot.slane %v766_v0, 2  ;;  %1772 = vmatprep.subr.bf16.mxu0 %v1866_v25  ;;  %v756_v38 = vrot.slane %v755_v36, 2 }
 0x54a   :  { %v777_v14 = vmax.f32 %v775_v11, %v776_v12 }
 0x54b   :  { %v768_v15 = vmax.f32 %v766_v0, %v767_v13  ;;  %v757_v40 = vadd.f32 %v756_v38, %v755_v36 }
 0x54c   :  { %v778_v17 = vrot.slane %v777_v14, 1 }
 0x54d   :  { %v769_v18 = vrot.slane %v768_v15, 1  ;;  %v758_v43 = vrot.slane %v757_v40, 1 }
 0x54e   :  { %v779_v4 = vmax.f32 %v777_v14, %v778_v17 }
 0x54f   :  { %v770_v19 = vmax.f32 %v768_v15, %v769_v18  ;;  %1769 = vmatmul.mubr.msk.bf16.vlgmr.msra.gmra.mrb[16].mxu0 %vm67_vm1, %v2029_v8  ;;  %v1865_v8 = vld [vmem:[%s2376_s7 + $0x28] sm:$0xff]   ;;  %v759_v45 = vadd.f32 %v758_v43, %v757_v40  ;;  %v1576_v18 = vld [vmem:[%s2375_s6 + $0x4] sm:$0x3] }
 0x550   :  { %1755 = vmatpush3.bf16.msra.mxu1 %v1865_v8  ;;  %1773 = vmatpush3.bf16.msra.mxu0 %v1866_v25  ;;  %v1101_v43 = vrot.slane %v1576_v18, %v2076_v51 }
 0x551   :  { %v786_v21 = vsel %vm354_vm5, %v779_v4, %v770_v19  ;;  %1774 = vmatprep.subr.bf16.mxu0 %v1867_v26  ;;  %v761_v47 = vmul.f32 0.0625, %v759_v45  ;;  %v1024_v4 = vrot.slane %v1576_v18, %v2046_v29 }
 0x552   :  { %787 = vrot.lane.b32.xlu0 %v786_v21, %s1926_s19 }
 0x554   :  { %1775 = vmatpush3.bf16.msra.mxu0 %v1867_v26 }
 0x555   :  { %1788 = vmatprep.subr.bf16.mxu0 %v1924_v2 }
 0x571   :  { %v487_v23 = vpop.permute.xlu1 %486 }
 0x572   :  { %v489_v24 = vmul.f32 %v2160_v37, %v487_v23  ;;  %v746_v37 = vadd.f32 %v745_v35, %v744_v33 }
 0x574   :  { %791 = vrot.lane.b32.xlu1 %v489_v24, %s1928_s21  ;;  %v747_v39 = vrot.slane %v746_v37, 2 }
 0x576   :  { %v748_v41 = vadd.f32 %v747_v39, %v746_v37 }
 0x578   :  { %v749_v44 = vrot.slane %v748_v41, 1 }
 0x57a   :  { %v750_v46 = vadd.f32 %v749_v44, %v748_v41 }
 0x57c   :  { %v760_v48 = vmul.f32 0.0625, %v750_v46 }
 0x57e   :  { %v782_v52 = vsel %vm354_vm5, %v761_v47, %v760_v48 }
 0x5c4   :  { %v788_v49 = vpop.permute.xlu0 %787 }
 0x5c5   :  { %v794_v53 = vsel %vm253_vm4, %v782_v52, %v788_v49 }
 0x5e6   :  { %v792_v55 = vpop.permute.xlu1 %791 }
 0x5e7   :  { %v795_v59 = vsel %vm364_vm6, %v794_v53, %v792_v55 }
 0x5e8   :  { %v796_v60 = vpack.c.bf16 %v795_v59, %v795_v59 }
 0x5ea   :  { %1757 = vmatmul.mubr.msk.bf16.vlgmr.msra.gmra.mrb[24].mxu1 %vm422_vm7, %v796_v60 }
 0x61a   :  { %v967_v62 = vpop.f32.mrb[12].mxu0 }
 0x61b   :  { %v1764_v1 = vpop.f32.mrb[13].mxu0  ;;  %v1015_v5 = vadd.f32 %v967_v62, %v2172_v54  ;;  %v1868_v54 = vld [vmem:[%s2374_s5 + $0x10] sm:$0xff]  }
 0x61c   :  { %v970_v3 = vpop.f32.mrb[14].mxu0  ;;  %1780 = vmatprep.subr.bf16.mxu1 %v1868_v54 }
 0x61d   :  { %v1016_v6 = vadd.f32 %v970_v3, %v2176_v57  ;;  %v1765_v7 = vpop.f32.mrb[15].mxu0  ;;  %1781 = vmatpush3.bf16.msra.mxu1 %v1868_v54  ;;  %v1869_v57 = vld [vmem:[%s2374_s5 + $0x18] sm:$0xff]  }
 0x61e   :  { %1782 = vmatprep.subr.bf16.mxu1 %v1869_v57 }
 0x61f   :  { %v1019_v9 = vpack.c.bf16 %v1016_v6, %v1015_v5 }
 0x621   :  { %1776 = vmatprep.mubr.msk.bf16.mxu0 %vm253_vm4, %v1019_v9  ;;  %1783 = vmatpush3.bf16.msra.mxu1 %v1869_v57  ;;  %v1870_v57 = vld [vmem:[%s2376_s7] sm:$0xff]  }
 0x622   :  { %v1008_v10 = vpop.f32.mrb[16].mxu0 }
 0x623   :  { %v1770_v11 = vpop.f32.mrb[17].mxu0  ;;  %v1017_v0 = vadd.f32 %v1008_v10, %v2170_v50 }
 0x624   :  { %v1011_v61 = vpop.f32.mrb[18].mxu0 }
 0x625   :  { %v1018_v63 = vadd.f32 %v1011_v61, %v2174_v56  ;;  %v1771_v12 = vpop.f32.mrb[19].mxu0 }
 0x627   :  { %v1020_v13 = vpack.c.bf16 %v1018_v63, %v1017_v0 }
 0x629   :  { %1777 = vmatmul.mubr.msk.bf16.vlgmr.msra.gmra.mrb[20].mxu0 %vm253_vm4, %v1020_v13 }
 0x62a   :  { %1800 = vmatprep.mubr.msk.bf16.mxu0 %vm1925_vm0, %v1924_v2  ;;  %1789 = vmatpush3.bf16.msra.mxu0 %v1870_v57  ;;  %v1438_v57 = vld [vmem:[%s2380_s11 + $0x8] sm:$0xff] }
 0x62b   :  { %1790 = vmatprep.subr.bf16.mxu0 %v1924_v2 }
 0x6bd   :  { %v889_v50 = vpop.f32.mrb[24].mxu1 }
 0x6be   :  { %v890_v56 = vadd.f32 %v2148_v58, %v889_v50  ;;  %v1758_v14 = vpop.f32.mrb[25].mxu1 }
 0x6bf   :  { %v892_v15 = vpop.f32.mrb[26].mxu1 }
 0x6c0   :  { %1884 = vtanh.f32 %v890_v56  ;;  %v1759_v16 = vpop.f32.mrb[27].mxu1  ;;  %v1575_v29 = vmul.f32 -1.442695, %v890_v56 }
 0x6c1   :  { %v1871_v16 = vld [vmem:[%s2376_s7 + $0x8] sm:$0xff]  }
 0x6c2   :  { %1886 = vpow2.f32 %v1575_v29  ;;  %1791 = vmatpush3.bf16.msra.mxu0 %v1871_v16  ;;  %v1873_v29 = vld [vmem:[%s2376_s7 + $0x18] sm:$0xff]  }
 0x6c3   :  { %1792 = vmatprep.subr.bf16.mxu0 %v1924_v2 }
 0x6ca   :  { %v1885_v17 = vpop.eup %1884 }
 0x6cb   :  { %904 = vrot.lane.b32.xlu0 %v1885_v17, %s1927_s26 }
 0x6cc   :  { %v1887_v33 = vpop.eup %1886 }
 0x6cd   :  { %v898_v34 = vadd.f32 1.0, %v1887_v33 }
 0x6cf   :  { %1888 = vrcp.f32 %v898_v34 }
 0x6d9   :  { %v2267_v35 = vpop.eup %1888 }
 0x6da   :  { %v902_v38 = vmul.f32 %v2267_v35, %v2165_v42 }
 0x6fc   :  { %v1778_v19 = vpop.f32.mrb[20].mxu0 }
 0x6fd   :  { %v1086_v20 = vadd.f32 %v1778_v19, %v1024_v4  ;;  %v1077_v21 = vpop.f32.mrb[21].mxu0 }
 0x6fe   :  { %v1078_v22 = vadd.f32 %v1077_v21, %v1024_v4  ;;  %v1779_v8 = vpop.f32.mrb[22].mxu0 }
 0x6ff   :  { %v1089_v23 = vadd.f32 %v1779_v8, %v1024_v4  ;;  %v1080_v24 = vpop.f32.mrb[23].mxu0  ;;  %v1094_v26 = vmax.f32 %v1086_v20, 0.0 }
 0x700   :  { %v1081_v25 = vadd.f32 %v1080_v24, %v1024_v4  ;;  %v1092_v28 = vmax.f32 %v1078_v22, 0.0 }
 0x701   :  { %v1095_v27 = vmax.f32 %v1089_v23, 0.0  ;;  %v1872_v23 = vld [vmem:[%s2376_s7 + $0x10] sm:$0xff]  }
 0x702   :  { %v1093_v30 = vmax.f32 %v1081_v25, 0.0  ;;  %1793 = vmatpush3.bf16.msra.mxu0 %v1872_v23 }
 0x703   :  { %v1097_v31 = vpack.c.bf16 %v1095_v27, %v1094_v26  ;;  %1794 = vmatprep.subr.bf16.mxu0 %v1924_v2 }
 0x704   :  { %v1096_v32 = vpack.c.bf16 %v1093_v30, %v1092_v28 }
 0x706   :  { %1784 = vmatprep.mubr.msk.bf16.mxu1 %vm253_vm4, %v1096_v32  ;;  %1795 = vmatpush3.bf16.msra.mxu0 %v1873_v29 }
 0x707   :  { %1785 = vmatmul.mubr.msk.bf16.vlgmr.msra.gmra.mrb[28].mxu1 %vm253_vm4, %v1097_v31  ;;  %1796 = vmatprep.subr.bf16.mxu0 %v1924_v2 }
 0x708   :  { %1812 = vmatprep.mubr.msk.f32.mxu1 %vm1925_vm0, %v1924_v2 }
 0x73d   :  { %v905_v36 = vpop.permute.xlu0 %904 }
 0x73e   :  { %v907_v37 = vmul.f32 %v2267_v35, %v905_v36 }
 0x740   :  { %909 = vrot.lane.b32.xlu1 %v907_v37, %s1926_s19 }
 0x7b2   :  { %v910_v39 = vpop.permute.xlu1 %909 }
 0x7b3   :  { %v2273_v40 = vadd.f32 %v910_v39, %v902_v38  ;;  %v1874_v38 = vld [vmem:[%s2376_s7 + $0x20] sm:$0xff]   ;;  %v1875_v39 = vld [vmem:[%s2376_s7 + $0x28] sm:$0xff]  }
 0x7b4   :  { %1797 = vmatpush3.bf16.msra.mxu0 %v1874_v38 }
 0x7b5   :  { %1890 = vtanh.f32 %v2273_v40  ;;  %1798 = vmatprep.subr.bf16.mxu0 %v1924_v2 }
 0x7b8   :  { %1799 = vmatpush3.bf16.msra.mxu0 %v1875_v39 }
 0x7bf   :  { %v1891_v41 = vpop.eup %1890 }
 0x7c0   :  { %915 = vrot.lane.b32.xlu0 %v1891_v41, %s1927_s26 }
 0x7da   :  { %v1786_v44 = vpop.f32.mrb[28].mxu1 }
 0x7db   :  { %v1163_v45 = vadd.f32 %v1786_v44, %v1101_v43  ;;  %v1154_v46 = vpop.f32.mrb[29].mxu1 }
 0x7dc   :  { %v1155_v47 = vadd.f32 %v1154_v46, %v1101_v43  ;;  %v1787_v48 = vpop.f32.mrb[30].mxu1 }
 0x7dd   :  { %v1171_v49 = vmax.f32 %v1163_v45, 0.0  ;;  %v1166_v52 = vadd.f32 %v1787_v48, %v1101_v43  ;;  %v1157_v53 = vpop.f32.mrb[31].mxu1 }
 0x7de   :  { %v1169_v55 = vmax.f32 %v1155_v47, 0.0  ;;  %v1158_v42 = vadd.f32 %v1157_v53, %v1101_v43 }
 0x7df   :  { %v1172_v59 = vmax.f32 %v1166_v52, 0.0  ;;  %v1182_v60 = vsel %vm253_vm4, %v1171_v49, 0.0  ;;  %v1202_v62 = vsel %vm253_vm4, %v1171_v49, -inf }
 0x7e0   :  { %v1170_v1 = vmax.f32 %v1158_v42, 0.0  ;;  %v1173_v3 = vsel %vm253_vm4, %v1169_v55, 0.0  ;;  %v1193_v51 = vsel %vm253_vm4, %v1169_v55, -inf }
 0x7e1   :  { %v1183_v5 = vsel %vm253_vm4, %v1172_v59, 0.0  ;;  %v1203_v6 = vsel %vm253_vm4, %v1172_v59, -inf }
 0x7e2   :  { %v1184_v7 = vadd.f32 %v1183_v5, %v1182_v60  ;;  %v1204_v9 = vmax.f32 %v1202_v62, %v1203_v6  ;;  %v1174_v10 = vsel %vm253_vm4, %v1170_v1, 0.0  ;;  %v1194_v11 = vsel %vm253_vm4, %v1170_v1, -inf }
 0x7e3   :  { %v1175_v61 = vadd.f32 %v1174_v10, %v1173_v3  ;;  %v1195_v0 = vmax.f32 %v1193_v51, %v1194_v11  ;;  %v1352_v10 = vld [vmem:[%s2378_s9 + $0x10] sm:$0xff]  ;;  %v1929_v11 = vmov 0.0|0.0  }
 0x7e4   :  { %v1185_v63 = vrot.slane %v1184_v7, 4  ;;  %v1205_v12 = vrot.slane %v1204_v9, 4  ;;  %1826 = vmatprep.subr.bf16.mxu1 %v1929_v11 }
 0x7e5   :  { %v1176_v13 = vrot.slane %v1175_v61, 4  ;;  %v1196_v54 = vrot.slane %v1195_v0, 4 }
 0x7e6   :  { %v1186_v50 = vadd.f32 %v1185_v63, %v1184_v7  ;;  %v1206_v56 = vmax.f32 %v1204_v9, %v1205_v12  ;;  %v1350_v7 = vld [vmem:[%s2378_s9] sm:$0xff]  ;;  %v1351_v9 = vld [vmem:[%s2378_s9 + $0x8] sm:$0xff] }
 0x7e7   :  { %v1177_v14 = vadd.f32 %v1176_v13, %v1175_v61  ;;  %v1197_v15 = vmax.f32 %v1195_v0, %v1196_v54  ;;  %v1827_v61 = vpack.c.bf16 %v1351_v9, %v1350_v7  ;;  %v1437_v54 = vld [vmem:[%s2380_s11] sm:$0xff] }
 0x7e8   :  { %v1187_v17 = vrot.slane %v1186_v50, 2  ;;  %v1207_v18 = vrot.slane %v1206_v56, 2 }
 0x7e9   :  { %v1178_v4 = vrot.slane %v1177_v14, 2  ;;  %v1198_v19 = vrot.slane %v1197_v15, 2  ;;  %1828 = vmatpush3.bf16.msra.mxu1 %v1827_v61 }
 0x7ea   :  { %v1188_v20 = vadd.f32 %v1187_v17, %v1186_v50  ;;  %v1208_v21 = vmax.f32 %v1206_v56, %v1207_v18  ;;  %1829 = vmatprep.subr.bf16.mxu1 %v1929_v11  ;;  %v1833_v50 = vpack.c.bf16 %v1438_v57, %v1437_v54  ;;  %v1604_v17 = vld [vmem:[%s2379_s10] ss:$0 sm:$0xff] }
 0x7eb   :  { %v1179_v22 = vadd.f32 %v1178_v4, %v1177_v14  ;;  %v1199_v8 = vmax.f32 %v1197_v15, %v1198_v19  ;;  %v1439_v14 = vld [vmem:[%s2380_s11 + $0x10] sm:$0xff]  ;;  %v1440_v15 = vld [vmem:[%s2380_s11 + $0x18] sm:$0xff]  ;;  %s1900_s11 = scalar_lea.vmem %s1530_s17, 32 }
 0x7ec   :  { %v1189_v24 = vrot.slane %v1188_v20, 1  ;;  %v1209_v25 = vrot.slane %v1208_v21, 1  ;;  %v1836_v16 = vpack.c.bf16 %v1440_v15, %v1439_v14  ;;  %p1901_p0 = scmp.ne.s32.totalorder %s1530_s17, %s1900_s11  ;;  %p1906_p2 = scmp.lt.s32.totalorder %s1900_s11, %s1900_s11 }
 0x7ed   :  { %v1180_v26 = vrot.slane %v1179_v22, 1  ;;  %v1200_v27 = vrot.slane %v1199_v8, 1 }
 0x7ee   :  { %v1210_v28 = vmax.f32 %v1208_v21, %v1209_v25  ;;  %v1190_v30 = vadd.f32 %v1189_v24, %v1188_v20  ;;  %p1907_p3 = por %p1906_p2, %p1905_p1 }
 0x7ef   :  { %v1201_v31 = vmax.f32 %v1199_v8, %v1200_v27  ;;  %v1181_v32 = vadd.f32 %v1180_v26, %v1179_v22 }
 0x7f0   :  { %v1192_v33 = vmul.f32 0.0625, %v1190_v30  ;;  %p1908_p4 = pnand %p1907_p3, %p1901_p0 }
 0x7f1   :  { %v1217_v34 = vsel %vm354_vm5, %v1210_v28, %v1201_v31  ;;  %v1191_v36 = vmul.f32 0.0625, %v1181_v32 }
 0x7f2   :  { %1218 = vrot.lane.b32.xlu1 %v1217_v34, %s1926_s19 }
 0x7f3   :  { %v1213_v37 = vsel %vm354_vm5, %v1192_v33, %v1191_v36 }
 0x832   :  { %v916_v41 = vpop.permute.xlu0 %915 }
 0x833   :  { %v918_v43 = vmul.f32 %v2267_v35, %v916_v41 }
 0x835   :  { %1222 = vrot.lane.b32.xlu0 %v918_v43, %s1928_s21 }
 0x864   :  { %v1219_v44 = vpop.permute.xlu1 %1218 }
 0x865   :  { %v1225_v45 = vsel %vm253_vm4, %v1213_v37, %v1219_v44 }
 0x8a7   :  { %v1223_v46 = vpop.permute.xlu0 %1222 }
 0x8a8   :  { %v1226_v47 = vsel %vm364_vm6, %v1225_v45, %v1223_v46 }
 0x8a9   :  { %v1227_v48 = vpack.c.bf16 %v1226_v47, %v1226_v47 }
 0x8ab   :  { %1801 = vmatmul.mubr.msk.bf16.vlgmr.msra.gmra.mrb[24].mxu0 %vm422_vm7, %v1227_v48 }
 0x97e   :  { %v1320_v49 = vpop.f32.mrb[24].mxu0 }
 0x97f   :  { %v1321_v52 = vadd.f32 %v2148_v58, %v1320_v49  ;;  %v1802_v53 = vpop.f32.mrb[25].mxu0 }
 0x980   :  { %v1323_v55 = vpop.f32.mrb[26].mxu0 }
 0x981   :  { %1892 = vtanh.f32 %v1321_v52  ;;  %v1803_v42 = vpop.f32.mrb[27].mxu0  ;;  %v1603_v35 = vmul.f32 -1.442695, %v1321_v52 }
 0x983   :  { %1894 = vpow2.f32 %v1603_v35 }
 0x98b   :  { %v1893_v59 = vpop.eup %1892 }
 0x98c   :  { %1335 = vrot.lane.b32.xlu1 %v1893_v59, %s1927_s26 }
 0x98d   :  { %v1895_v60 = vpop.eup %1894 }
 0x98e   :  { %v1329_v62 = vadd.f32 1.0, %v1895_v60 }
 0x990   :  { %1896 = vrcp.f32 %v1329_v62 }
 0x99a   :  { %v1897_v1 = vpop.eup %1896 }
 0x99b   :  { %v1333_v5 = vmul.f32 %v1897_v1, %v2273_v40  ;;  %v1353_v40 = vld [vmem:[%s2378_s9 + $0x18] sm:$0xff] }
 0x99c   :  { %v1830_v0 = vpack.c.bf16 %v1353_v40, %v1352_v10 }
 0x99e   :  { %1831 = vmatpush3.bf16.msra.mxu1 %v1830_v0 }
 0x99f   :  { %1832 = vmatprep.subr.bf16.mxu1 %v1929_v11 }
 0x9fe   :  { %v1336_v3 = vpop.permute.xlu1 %1335 }
 0x9ff   :  { %v1338_v51 = vmul.f32 %v1897_v1, %v1336_v3 }
 0xa01   :  { %1340 = vrot.lane.b32.xlu0 %v1338_v51, %s1926_s19 }
 0xa73   :  { %v1341_v58 = vpop.permute.xlu0 %1340 }
 0xa74   :  { %v1343_v6 = vadd.f32 %v1341_v58, %v1333_v5 }
 0xa76   :  { %1898 = vtanh.f32 %v1343_v6 }
 0xa80   :  { %v1899_v63 = vpop.eup %1898 }
 0xa81   :  { %1346 = vrot.lane.b32.xlu1 %v1899_v63, %s1927_s26 }
 0xaf3   :  { %v1347_v12 = vpop.permute.xlu1 %1346 }
 0xaf4   :  { %v1349_v13 = vmul.f32 %v1897_v1, %v1347_v12 }
 0xaf6   :  { %1362 = vrot.lane.b32.xlu0 %v1349_v13, %s1926_s19 }
 0xb68   :  { %v1363_v56 = vpop.permute.xlu0 %1362 }
 0xb69   :  { %1813 = vmatmul.mubr.msk.f32.vlgmr.msra.gmra.mrb[32].mxu1 %vm253_vm4, %v1363_v56 }
 0xb6a   :  { %1834 = vmatpush3.bf16.msra.mxu1 %v1833_v50  ;;  %1823 = vmatprep.mubr.msk.f32.mxu1 %vm1925_vm0, %v1924_v2  ;;  %v1606_v2 = vld [vmem:[%s2381_s12] ss:$0 sm:$0xff] }
 0xb6b   :  { %1835 = vmatprep.subr.bf16.mxu1 %v1929_v11 }
 0xb6e   :  { %1837 = vmatpush3.bf16.msra.mxu1 %v1836_v16 }
 0xc3c   :  { %v1432_v18 = vpop.f32.mrb[32].mxu1 }
 0xc3d   :  { %v1433_v4 = vadd.f32 %v1604_v17, %v1432_v18  ;;  %v1814_v19 = vpop.f32.mrb[33].mxu1 }
 0xc3f   :  { %v1436_v20 = vmax.f32 %v1433_v4, 0.0 }
 0xc41   :  { %1824 = vmatmul.mubr.msk.f32.vlgmr.msra.gmra.mrb[34].mxu1 %vm253_vm4, %v1436_v20 }
 0xd14   :  { %v1517_v21 = vpop.f32.mrb[34].mxu1 }
 0xd15   :  { %v1518_v22 = vadd.f32 %v1606_v2, %v1517_v21  ;;  %v1825_v8 = vpop.f32.mrb[35].mxu1 }
 0xd17   :  { %1522 = vst.msk [vmem:[#allocation2] sm:$0x3] %vm1521_vm8, %v1518_v22 }
 0xd18   :  { %1911 = shalt.err (!%p1908_p4)
}
 0xd19   :  { %s1912_s1 = scalar_lea.hbm %s2382_s13, 32 }
 0xd1a   :  { %p1913_p5 = scmp.ne.s32.totalorder %s2382_s13, %s1912_s1  ;;  %p1916_p6 = scmp.lt.u32.totalorder %s1912_s1, %s2382_s13 }
 0xd1c   :  { %p1918_p7 = pnand %p1916_p6, %p1913_p5 }
 0xd1e   :  { %1921 = shalt.err (!%p1918_p7)
}
 0xd1f   :  { %1532 = dma.vmem_to_hbm [thread:$0]  %s1530_s17, 32, %s2382_s13, [#allocation3]  }
 0xd20   :  { %1922 = dma.done.wait [#allocation3], 32  }
 0xd21   :  { %1923 = vsyncadd [#allocation3], 4294967264 }
 0xd22   :  { %1536 = vsyncpa [#allocation3], 1 }

</bundles_post_ra>
